<compile_context>
chip_gen: v5e
topology: v5e:2x2
jax: 0.10.0
libtpu: 0.0.40
codegen_flags: <defaults>
</compile_context>

<pallas_src>
import functools
import math

import numpy as np

import jax
import jax.numpy as jnp
from jax import lax
from jax.experimental import pallas as pl
from jax.experimental.pallas import tpu as pltpu

F32 = jnp.float32


# --------------------------------------------------------------------------
# Kernel 1: EigenEncoding transformer block + fused decoders + masked node sum
# --------------------------------------------------------------------------
def _ee_decoder_kernel(nheads, H,
                       eeig_ref, pad_ref,
                       sw_ref, sb_ref,
                       g1_ref, b1_ref,
                       wqkv_ref, bqkv_ref, wo_ref, ob_ref,
                       g2_ref, b2_ref,
                       f1w_ref, f1b_ref, f2w_ref, f2b_ref,
                       dw_ref, db_ref,
                       out_ref):
    eeig = eeig_ref[0]          # [N, H+1]  concat([e, sin(pe), cos(pe)])
    pad = pad_ref[0]            # [1, N]    1.0 where padded (key_padding_mask)

    hd = H // nheads

    # SineEncoding: one lane-dense matmul on the concatenated features.
    eig = jnp.dot(eeig, sw_ref[...], preferred_element_type=F32) + sb_ref[...]  # [N, H]

    def layernorm(x, g, b):
        mu = jnp.mean(x, axis=-1, keepdims=True)
        var = jnp.mean(jnp.square(x - mu), axis=-1, keepdims=True)
        return (x - mu) * lax.rsqrt(var + 1e-5) * g + b

    # ---- multi-head self-attention (pre-norm, residual; dropout = identity)
    xn = layernorm(eig, g1_ref[...], b1_ref[...])
    qkv = jnp.dot(xn, wqkv_ref[...], preferred_element_type=F32) + bqkv_ref[...]  # [N, 3H]
    q = qkv[:, 0:H]
    k = qkv[:, H:2 * H]
    v = qkv[:, 2 * H:3 * H]

    scale = 1.0 / math.sqrt(hd)
    ctx_cols = []
    # Static head loop with static lane slices.  For large N this should be
    # replaced by a key-tiled (flash-style) loop to bound [N, N] live ranges.
    for h in range(nheads):
        qh = q[:, h * hd:(h + 1) * hd]
        kh = k[:, h * hd:(h + 1) * hd]
        vh = v[:, h * hd:(h + 1) * hd]
        # q @ k^T via contraction on the last dims (native attention pattern).
        s = lax.dot_general(qh, kh, (((1,), (1,)), ((), ())),
                            preferred_element_type=F32) * scale          # [N, N]
        s = s - 1e9 * pad                       # mask padded keys
        s = s - jnp.max(s, axis=-1, keepdims=True)
        p = jnp.exp(s)
        p = p * pl.reciprocal(jnp.sum(p, axis=-1, keepdims=True), approx=True)
        ctx_cols.append(jnp.dot(p, vh, preferred_element_type=F32))       # [N, hd]
    ctx = jnp.concatenate(ctx_cols, axis=-1)                              # [N, H]
    mha = jnp.dot(ctx, wo_ref[...], preferred_element_type=F32) + ob_ref[...]
    eig = eig + mha

    # ---- FFN (pre-norm, residual), exact erf-based GELU as nn.GELU()
    yn = layernorm(eig, g2_ref[...], b2_ref[...])
    h1 = jnp.dot(yn, f1w_ref[...], preferred_element_type=F32) + f1b_ref[...]
    h1 = 0.5 * h1 * (1.0 + lax.erf(h1 * (1.0 / math.sqrt(2.0))))
    h2 = jnp.dot(h1, f2w_ref[...], preferred_element_type=F32) + f2b_ref[...]
    eig = eig + h2                                                        # eig_filter

    # ---- fused decoders (scaling | wavelet | scales, padded to 128 lanes),
    #      masked node-sum fused as a single [1,N]@[N,Ppad] matmul.
    d = jnp.dot(eig, dw_ref[...], preferred_element_type=F32) + db_ref[...]   # [N, Ppad]
    valid_row = 1.0 - pad                                                     # [1, N]
    out_ref[0] = jnp.dot(valid_row, d, preferred_element_type=F32)            # [1, Ppad]


# --------------------------------------------------------------------------
# Kernel 2: Chebyshev scaling / wavelet filter construction (N on lanes)
# --------------------------------------------------------------------------
def _filter_kernel(num_n, L, J, cs_ref, cw_ref, cj_ref, eva_ref, out_ref):
    b = pl.program_id(0)
    eva = eva_ref[0]                      # [1, N]   eigenvalues (lane-dense)

    # Scaling branch: T_odd Chebyshev terms of (eva - 1) — shared by all layers.
    ys = eva - 1.0
    te_s = jnp.ones_like(ys)
    to_s = ys
    scaling_terms = [0.5 * (1.0 - to_s)]
    for _ in range(1, num_n):
        te_s = 2.0 * ys * to_s - te_s
        to_s = 2.0 * ys * te_s - to_s
        scaling_terms.append(0.5 * (1.0 - to_s))

    for l in range(L):
        cs_base = b * (L * num_n) + l * num_n
        acc_s = cs_ref[cs_base + 0] * scaling_terms[0]
        for n in range(1, num_n):
            acc_s = acc_s + cs_ref[cs_base + n] * scaling_terms[n]        # [1, N]

        # Wavelet branch: f = eva * scale_j ; values > 2 are set to 0 (so they
        # become -1 after the -1 shift) — matches the PyTorch reference, which
        # zeros filter_signals_wave entries > 2.0 before subtracting 1.
        cj_base = b * (L * J) + l * J
        rows = [eva * cj_ref[cj_base + j] for j in range(J)]
        fw = jnp.concatenate(rows, axis=0)                                # [J, N]
        fw = jnp.where(fw > 2.0, jnp.zeros_like(fw), fw)
        yw = fw - 1.0

        te_w = jnp.ones_like(yw)
        to_w = yw
        cw_base = b * (L * num_n) + l * num_n
        # NOTE: first wavelet term uses T_0 = 1, so 0.5*(1 - T_0) == 0 — this
        # matches the reference's gen_base(..., 'wavelet') exactly.
        acc_w = cw_ref[cw_base + 0] * (0.5 * (1.0 - te_w))
        for n in range(1, num_n):
            te_w = 2.0 * yw * to_w - te_w
            to_w = 2.0 * yw * te_w - to_w
            acc_w = acc_w + cw_ref[cw_base + n] * (0.5 * (1.0 - te_w))    # [J, N]

        out_ref[0, l] = jnp.concatenate([acc_s, acc_w], axis=0)           # [1+J, N]


# --------------------------------------------------------------------------
# Wrappers
# --------------------------------------------------------------------------
def _w_spec(shape):
    zeros = (0,) * len(shape)
    return pl.BlockSpec(shape, lambda b, _z=zeros: _z)


def _ee_and_decoders(eva_dense, pad_1d, params, *, nheads):
    B, N = eva_dense.shape
    H = params['sb'].shape[-1]
    Ppad = params['dw_fused'].shape[-1]

    # glue: sinusoidal features of the eigenvalues, concatenated in the wrapper
    # so the kernel does a single lane-dense [N, H+1] @ [H+1, H] matmul.
    div = jnp.exp(jnp.arange(0, H, 2, dtype=F32) * (-math.log(10000.0) / H))
    pe = (eva_dense * 100.0)[..., None] * div                 # [B, N, H//2]
    eeig = jnp.concatenate([eva_dense[..., None].astype(F32),
                            jnp.sin(pe), jnp.cos(pe)], axis=-1)  # [B, N, H+1]
    pad_row = pad_1d.astype(F32)[:, None, :]                     # [B, 1, N]

    data_specs = [
        pl.BlockSpec((1, N, H + 1), lambda b: (b, 0, 0)),
        pl.BlockSpec((1, 1, N), lambda b: (b, 0, 0)),
    ]
    w_order = ['sw', 'sb', 'ln1_g', 'ln1_b',
               'wqkv', 'bqkv', 'wo', 'ob',
               'ln2_g', 'ln2_b', 'f1w', 'f1b', 'f2w', 'f2b',
               'dw_fused', 'db_fused']
    w_specs = [_w_spec(params[k].shape) for k in w_order]
    w_vals = [params[k] for k in w_order]

    kern = functools.partial(_ee_decoder_kernel, nheads, H)
    sum_fused = pl.pallas_call(
        kern,
        grid=(B,),
        in_specs=data_specs + w_specs,
        out_specs=pl.BlockSpec((1, 1, Ppad), lambda b: (b, 0, 0)),
        out_shape=jax.ShapeDtypeStruct((B, 1, Ppad), F32),
        compiler_params=pltpu.CompilerParams(
            dimension_semantics=("parallel",),
            vmem_limit_bytes=32 * 1024 * 1024),
    )(eeig, pad_row, *w_vals)
    return sum_fused


def _wave_filters(eva_dense, coe_scaling, coe_wavelet, coe_scales, *, num_n):
    B, L, _ = coe_scaling.shape
    N = eva_dense.shape[1]
    J = coe_scales.shape[-1]

    eva_row = eva_dense[:, None, :].astype(F32)                 # (B, 1, N)
    cs_flat = coe_scaling.reshape(B * L * num_n).astype(F32)    # 1-D SMEM coeffs
    cw_flat = coe_wavelet.reshape(B * L * num_n).astype(F32)
    cj_flat = coe_scales.reshape(B * L * J).astype(F32)

    kern = functools.partial(_filter_kernel, num_n, L, J)
    out = pl.pallas_call(
        kern,
        grid=(B,),
        in_specs=[
            pl.BlockSpec(memory_space=pltpu.MemorySpace.SMEM),  # coe_scaling
            pl.BlockSpec(memory_space=pltpu.MemorySpace.SMEM),  # coe_wavelet
            pl.BlockSpec(memory_space=pltpu.MemorySpace.SMEM),  # coe_scales
            pl.BlockSpec((1, 1, N), lambda b: (b, 0, 0)),       # eigenvalues
        ],
        out_specs=pl.BlockSpec((1, L, 1 + J, N), lambda b: (b, 0, 0, 0)),
        out_shape=jax.ShapeDtypeStruct((B, L, 1 + J, N), F32),
        compiler_params=pltpu.CompilerParams(
            dimension_semantics=("parallel",)),
    )(cs_flat, cw_flat, cj_flat, eva_row)
    # (B, L, 1+J, N) -> (B, L, N, 1+J)   (glue transpose in plain JAX)
    return jnp.transpose(out, (0, 1, 3, 2))


def wave_generator_v2_forward(eigenvector, eigenvalue, lengths, params, *,
                              layers, num_n, num_J, nheads, pre_s,
                              tight_frames=False):
    # `lengths` must be host-side (list / numpy) so that max_length is a static
    # shape — avoids concretizing a traced value under jit.
    lengths_np = np.asarray(lengths, dtype=np.int32)
    N = int(lengths_np.max())                                   # static max_length
    lengths = jnp.asarray(lengths_np)

    max_node = eigenvector.shape[-1]
    B = eigenvector.shape[0] // max_node

    evc_dense = eigenvector.reshape(B, max_node, max_node)[:, :N, :N]
    eva_dense = eigenvalue.reshape(B, max_node)[:, :N].astype(F32)

    idx = jnp.arange(N)
    pad_1d = idx[None, :] >= lengths[:, None]                   # eig_mask (True = pad)
    valid_1d = jnp.logical_not(pad_1d)
    edge_idx = valid_1d[:, :, None] & valid_1d[:, None, :]      # mask2d.bool()

    Kn = num_n * layers
    KJ = num_J * layers

    # --- kernel 1: transformer encoding + fused decoders + masked node sums ---
    sum_fused = _ee_and_decoders(eva_dense, pad_1d, params, nheads=nheads)
    fused = sum_fused[:, 0, :]                                  # [B, Ppad]
    sum_s = fused[:, :Kn]
    sum_w = fused[:, Kn:2 * Kn]
    sum_J = fused[:, 2 * Kn:2 * Kn + KJ]

    len_f = lengths.astype(F32)

    def finish(s, c):               # rearrange 'a (c d) -> a d c' + /length
        x = s.reshape(B, c, layers)
        x = jnp.transpose(x, (0, 2, 1))
        return x / (len_f[:, None, None] + 1e-8)

    coe_scaling = jax.nn.softmax(finish(sum_s, num_n), axis=-1)       # [B, L, num_n]
    coe_wavelet = jax.nn.softmax(finish(sum_w, num_n), axis=-1)       # [B, L, num_n]
    scale_scale = jnp.ones((1, 1, num_J), F32) * jnp.asarray(pre_s, F32).reshape(1, 1, -1)
    coe_scales = jax.nn.sigmoid(finish(sum_J, num_J)) * scale_scale   # [B, L, num_J]

    # --- kernel 2: Chebyshev filter synthesis (N on lanes, layers in-kernel) ---
    filter_signals_after = _wave_filters(
        eva_dense, coe_scaling, coe_wavelet, coe_scales, num_n=num_n)

    if tight_frames:  # TODO(synk): cfg.WaveGC.tight_frames comes from external config
        filter_signals_after = filter_signals_after / (
            jnp.linalg.norm(filter_signals_after, axis=-1, keepdims=True) + 1e-8)

    return {'evc_dense': evc_dense,
            'filter_signals_after': filter_signals_after,
            'edge_idx': edge_idx}


# --------------------------------------------------------------------------
# Deterministic parameter construction (synthetic — no checkpoint loading)
# --------------------------------------------------------------------------
def init_params(key, H, layers, num_n, num_J, nheads):
    ks = list(jax.random.split(key, 12))

    def lin(k, fin, fout):
        bound = 1.0 / math.sqrt(fin)
        kw, kb = jax.random.split(k)
        w = jax.random.uniform(kw, (fin, fout), F32, -bound, bound)
        b = jax.random.uniform(kb, (1, fout), F32, -bound, bound)
        return w, b

    p = {}
    p['sw'], p['sb'] = lin(ks[0], H + 1, H)            # SineEncoding.eig_w (fused)
    p['ln1_g'] = jnp.ones((1, H), F32)
    p['ln1_b'] = jnp.zeros((1, H), F32)
    wq, bq = lin(ks[1], H, H)                          # MHA in_proj, fused [H, 3H]
    wk, bk = lin(ks[2], H, H)
    wv, bv = lin(ks[3], H, H)
    p['wqkv'] = jnp.concatenate([wq, wk, wv], axis=1)
    p['bqkv'] = jnp.concatenate([bq, bk, bv], axis=1)
    p['wo'], p['ob'] = lin(ks[4], H, H)                # MHA out_proj
    p['ln2_g'] = jnp.ones((1, H), F32)
    p['ln2_b'] = jnp.zeros((1, H), F32)
    p['f1w'], p['f1b'] = lin(ks[5], H, H)              # FFN
    p['f2w'], p['f2b'] = lin(ks[6], H, H)

    dsw, dsb = lin(ks[7], H, num_n * layers)           # decoder_scaling
    dww, dwb = lin(ks[8], H, num_n * layers)           # decoder_wavelet
    dJw, dJb = lin(ks[9], H, num_J * layers)           # decoder_scales
    Kout = 2 * num_n * layers + num_J * layers
    Ppad = ((Kout + 127) // 128) * 128                 # lane-dense output slab
    dw = jnp.concatenate([dsw, dww, dJw], axis=1)
    db = jnp.concatenate([dsb, dwb, dJb], axis=1)
    p['dw_fused'] = jnp.pad(dw, ((0, 0), (0, Ppad - Kout)))
    p['db_fused'] = jnp.pad(db, ((0, 0), (0, Ppad - Kout)))
    return p


# --------------------------------------------------------------------------
if __name__ == "__main__":
    key = jax.random.PRNGKey(0)
    B, max_node = 2, 16
    hidden_dim, nheads, layers, num_n, num_J = 32, 4, 2, 4, 3
    pre_s = [1.0, 2.0, 4.0]
    lengths = [16, 12]                                 # host-side (static max)

    k_evc, k_eva, k_par = jax.random.split(key, 3)
    eigenvector = jax.random.normal(k_evc, (B * max_node, max_node), dtype=F32)
    eigenvalue = jax.random.uniform(k_eva, (B * max_node,), dtype=F32,
                                    minval=0.0, maxval=2.0)
    params = init_params(k_par, hidden_dim, layers, num_n, num_J, nheads)

    out = wave_generator_v2_forward(
        eigenvector, eigenvalue, lengths, params,
        layers=layers, num_n=num_n, num_J=num_J, nheads=nheads, pre_s=pre_s,
        tight_frames=False)
    out = jax.block_until_ready(out)

    fsa = out['filter_signals_after']
    N = max(lengths)
    assert fsa.shape == (B, layers, N, 1 + num_J)
    assert bool(jnp.all(jnp.isfinite(fsa)))
    print("KERNEL_OK")
</pallas_src>

<mosaic_0001>
module attributes {stable_mosaic.version = 11 : i64} {
  func.func @_ee_decoder_kernel(%arg0: i32, %arg1: memref<1x16x33xf32, #tpu.memory_space<vmem>>, %arg2: memref<1x1x16xf32, #tpu.memory_space<vmem>>, %arg3: memref<33x32xf32, #tpu.memory_space<vmem>>, %arg4: memref<1x32xf32, #tpu.memory_space<vmem>>, %arg5: memref<1x32xf32, #tpu.memory_space<vmem>>, %arg6: memref<1x32xf32, #tpu.memory_space<vmem>>, %arg7: memref<32x96xf32, #tpu.memory_space<vmem>>, %arg8: memref<1x96xf32, #tpu.memory_space<vmem>>, %arg9: memref<32x32xf32, #tpu.memory_space<vmem>>, %arg10: memref<1x32xf32, #tpu.memory_space<vmem>>, %arg11: memref<1x32xf32, #tpu.memory_space<vmem>>, %arg12: memref<1x32xf32, #tpu.memory_space<vmem>>, %arg13: memref<32x32xf32, #tpu.memory_space<vmem>>, %arg14: memref<1x32xf32, #tpu.memory_space<vmem>>, %arg15: memref<32x32xf32, #tpu.memory_space<vmem>>, %arg16: memref<1x32xf32, #tpu.memory_space<vmem>>, %arg17: memref<32x128xf32, #tpu.memory_space<vmem>>, %arg18: memref<1x128xf32, #tpu.memory_space<vmem>>, %arg19: memref<1x1x128xf32, #tpu.memory_space<vmem>>) attributes {dimension_semantics = [#tpu.dimension_semantics<parallel>], iteration_bounds = array<i64: 2>, scalar_prefetch = 0 : i64, scratch_operands = 0 : i64, tpu.core_type = #tpu.core_type<tc>, window_params = [{transform_indices = @transform_0, window_bounds = array<i64: 1, 16, 33>}, {transform_indices = @transform_1, window_bounds = array<i64: 1, 1, 16>}, {pipeline_mode = #tpu.pipeline_mode<synchronous>, transform_indices = @transform_2, window_bounds = array<i64: 33, 32>}, {pipeline_mode = #tpu.pipeline_mode<synchronous>, transform_indices = @transform_3, window_bounds = array<i64: 1, 32>}, {pipeline_mode = #tpu.pipeline_mode<synchronous>, transform_indices = @transform_4, window_bounds = array<i64: 1, 32>}, {pipeline_mode = #tpu.pipeline_mode<synchronous>, transform_indices = @transform_5, window_bounds = array<i64: 1, 32>}, {pipeline_mode = #tpu.pipeline_mode<synchronous>, transform_indices = @transform_6, window_bounds = array<i64: 32, 96>}, {pipeline_mode = #tpu.pipeline_mode<synchronous>, transform_indices = @transform_7, window_bounds = array<i64: 1, 96>}, {pipeline_mode = #tpu.pipeline_mode<synchronous>, transform_indices = @transform_8, window_bounds = array<i64: 32, 32>}, {pipeline_mode = #tpu.pipeline_mode<synchronous>, transform_indices = @transform_9, window_bounds = array<i64: 1, 32>}, {pipeline_mode = #tpu.pipeline_mode<synchronous>, transform_indices = @transform_10, window_bounds = array<i64: 1, 32>}, {pipeline_mode = #tpu.pipeline_mode<synchronous>, transform_indices = @transform_11, window_bounds = array<i64: 1, 32>}, {pipeline_mode = #tpu.pipeline_mode<synchronous>, transform_indices = @transform_12, window_bounds = array<i64: 32, 32>}, {pipeline_mode = #tpu.pipeline_mode<synchronous>, transform_indices = @transform_13, window_bounds = array<i64: 1, 32>}, {pipeline_mode = #tpu.pipeline_mode<synchronous>, transform_indices = @transform_14, window_bounds = array<i64: 32, 32>}, {pipeline_mode = #tpu.pipeline_mode<synchronous>, transform_indices = @transform_15, window_bounds = array<i64: 1, 32>}, {pipeline_mode = #tpu.pipeline_mode<synchronous>, transform_indices = @transform_16, window_bounds = array<i64: 32, 128>}, {pipeline_mode = #tpu.pipeline_mode<synchronous>, transform_indices = @transform_17, window_bounds = array<i64: 1, 128>}, {transform_indices = @transform_18, window_bounds = array<i64: 1, 1, 128>}]} {
    %c0 = arith.constant 0 : index
    %c0_0 = arith.constant 0 : index
    %c0_1 = arith.constant 0 : index
    %0 = vector.load %arg1[%c0, %c0_0, %c0_1] : memref<1x16x33xf32, #tpu.memory_space<vmem>>, vector<1x16x33xf32>
    %1 = vector.shape_cast %0 : vector<1x16x33xf32> to vector<16x33xf32>
    %c0_2 = arith.constant 0 : index
    %c0_3 = arith.constant 0 : index
    %c0_4 = arith.constant 0 : index
    %2 = vector.load %arg2[%c0_2, %c0_3, %c0_4] : memref<1x1x16xf32, #tpu.memory_space<vmem>>, vector<1x1x16xf32>
    %3 = vector.shape_cast %2 : vector<1x1x16xf32> to vector<1x16xf32>
    %c0_5 = arith.constant 0 : index
    %c0_6 = arith.constant 0 : index
    %4 = vector.load %arg3[%c0_5, %c0_6] : memref<33x32xf32, #tpu.memory_space<vmem>>, vector<33x32xf32>
    %cst = arith.constant dense<0.000000e+00> : vector<16x32xf32>
    %5 = tpu.matmul %1, %4, %cst {dimension_numbers = #tpu.dot_dimension_numbers<[1], [0], [0], [1], [0, 0, 1, 1], [], []>} : vector<16x33xf32>, vector<33x32xf32>, vector<16x32xf32> -> vector<16x32xf32>
    %c0_7 = arith.constant 0 : index
    %c0_8 = arith.constant 0 : index
    %6 = vector.load %arg4[%c0_7, %c0_8] : memref<1x32xf32, #tpu.memory_space<vmem>>, vector<1x32xf32>
    %7 = vector.broadcast %6 : vector<1x32xf32> to vector<16x32xf32>
    %8 = arith.addf %5, %7 : vector<16x32xf32>
    %c0_9 = arith.constant 0 : index
    %c0_10 = arith.constant 0 : index
    %9 = vector.load %arg5[%c0_9, %c0_10] : memref<1x32xf32, #tpu.memory_space<vmem>>, vector<1x32xf32>
    %c0_11 = arith.constant 0 : index
    %c0_12 = arith.constant 0 : index
    %10 = vector.load %arg6[%c0_11, %c0_12] : memref<1x32xf32, #tpu.memory_space<vmem>>, vector<1x32xf32>
    %cst_13 = arith.constant dense<0.000000e+00> : vector<16xf32>
    %11 = vector.multi_reduction <add>, %8, %cst_13 [1] : vector<16x32xf32> to vector<16xf32>
    %12 = vector.shape_cast %11 : vector<16xf32> to vector<16x1xf32>
    %cst_14 = arith.constant 3.200000e+01 : f32
    %13 = vector.broadcast %cst_14 : f32 to vector<16x1xf32>
    %14 = arith.divf %12, %13 : vector<16x1xf32>
    %15 = vector.broadcast %14 : vector<16x1xf32> to vector<16x32xf32>
    %16 = arith.subf %8, %15 : vector<16x32xf32>
    %17 = arith.mulf %16, %16 : vector<16x32xf32>
    %cst_15 = arith.constant dense<0.000000e+00> : vector<16xf32>
    %18 = vector.multi_reduction <add>, %17, %cst_15 [1] : vector<16x32xf32> to vector<16xf32>
    %19 = vector.shape_cast %18 : vector<16xf32> to vector<16x1xf32>
    %cst_16 = arith.constant 3.200000e+01 : f32
    %20 = vector.broadcast %cst_16 : f32 to vector<16x1xf32>
    %21 = arith.divf %19, %20 : vector<16x1xf32>
    %22 = vector.broadcast %14 : vector<16x1xf32> to vector<16x32xf32>
    %23 = arith.subf %8, %22 : vector<16x32xf32>
    %cst_17 = arith.constant 9.99999974E-6 : f32
    %24 = vector.broadcast %cst_17 : f32 to vector<16x1xf32>
    %25 = arith.addf %21, %24 : vector<16x1xf32>
    %26 = math.rsqrt %25 : vector<16x1xf32>
    %27 = vector.broadcast %26 : vector<16x1xf32> to vector<16x32xf32>
    %28 = arith.mulf %23, %27 : vector<16x32xf32>
    %29 = vector.broadcast %9 : vector<1x32xf32> to vector<16x32xf32>
    %30 = arith.mulf %28, %29 : vector<16x32xf32>
    %31 = vector.broadcast %10 : vector<1x32xf32> to vector<16x32xf32>
    %32 = arith.addf %30, %31 : vector<16x32xf32>
    %c0_18 = arith.constant 0 : index
    %c0_19 = arith.constant 0 : index
    %33 = vector.load %arg7[%c0_18, %c0_19] : memref<32x96xf32, #tpu.memory_space<vmem>>, vector<32x96xf32>
    %cst_20 = arith.constant dense<0.000000e+00> : vector<16x96xf32>
    %34 = tpu.matmul %32, %33, %cst_20 {dimension_numbers = #tpu.dot_dimension_numbers<[1], [0], [0], [1], [0, 0, 1, 1], [], []>} : vector<16x32xf32>, vector<32x96xf32>, vector<16x96xf32> -> vector<16x96xf32>
    %c0_21 = arith.constant 0 : index
    %c0_22 = arith.constant 0 : index
    %35 = vector.load %arg8[%c0_21, %c0_22] : memref<1x96xf32, #tpu.memory_space<vmem>>, vector<1x96xf32>
    %36 = vector.broadcast %35 : vector<1x96xf32> to vector<16x96xf32>
    %37 = arith.addf %34, %36 : vector<16x96xf32>
    %38 = vector.extract_strided_slice %37 {offsets = [0, 0], sizes = [16, 32], strides = [1, 1]} : vector<16x96xf32> to vector<16x32xf32>
    %39 = vector.extract_strided_slice %37 {offsets = [0, 32], sizes = [16, 32], strides = [1, 1]} : vector<16x96xf32> to vector<16x32xf32>
    %40 = vector.extract_strided_slice %37 {offsets = [0, 64], sizes = [16, 32], strides = [1, 1]} : vector<16x96xf32> to vector<16x32xf32>
    %41 = vector.extract_strided_slice %38 {offsets = [0, 0], sizes = [16, 8], strides = [1, 1]} : vector<16x32xf32> to vector<16x8xf32>
    %42 = vector.extract_strided_slice %39 {offsets = [0, 0], sizes = [16, 8], strides = [1, 1]} : vector<16x32xf32> to vector<16x8xf32>
    %43 = vector.extract_strided_slice %40 {offsets = [0, 0], sizes = [16, 8], strides = [1, 1]} : vector<16x32xf32> to vector<16x8xf32>
    %cst_23 = arith.constant dense<0.000000e+00> : vector<16x16xf32>
    %44 = tpu.matmul %41, %42, %cst_23 {dimension_numbers = #tpu.dot_dimension_numbers<[1], [1], [0], [0], [0, 0, 1, 0], [], []>} : vector<16x8xf32>, vector<16x8xf32>, vector<16x16xf32> -> vector<16x16xf32>
    %cst_24 = arith.constant 0.353553385 : f32
    %45 = vector.broadcast %cst_24 : f32 to vector<16x16xf32>
    %46 = arith.mulf %44, %45 : vector<16x16xf32>
    %cst_25 = arith.constant 1.000000e+09 : f32
    %47 = vector.broadcast %cst_25 : f32 to vector<1x16xf32>
    %48 = arith.mulf %47, %3 : vector<1x16xf32>
    %49 = vector.broadcast %48 : vector<1x16xf32> to vector<16x16xf32>
    %50 = arith.subf %46, %49 : vector<16x16xf32>
    %cst_26 = arith.constant dense<0xFF800000> : vector<16xf32>
    %51 = vector.multi_reduction <maximumf>, %50, %cst_26 [1] : vector<16x16xf32> to vector<16xf32>
    %52 = vector.shape_cast %51 : vector<16xf32> to vector<16x1xf32>
    %53 = vector.broadcast %52 : vector<16x1xf32> to vector<16x16xf32>
    %54 = arith.subf %50, %53 : vector<16x16xf32>
    %55 = math.exp %54 : vector<16x16xf32>
    %cst_27 = arith.constant dense<0.000000e+00> : vector<16xf32>
    %56 = vector.multi_reduction <add>, %55, %cst_27 [1] : vector<16x16xf32> to vector<16xf32>
    %57 = vector.shape_cast %56 : vector<16xf32> to vector<16x1xf32>
    %58 = tpu.reciprocal %57 {approx = true} : vector<16x1xf32> -> vector<16x1xf32>
    %59 = vector.broadcast %58 : vector<16x1xf32> to vector<16x16xf32>
    %60 = arith.mulf %55, %59 : vector<16x16xf32>
    %cst_28 = arith.constant dense<0.000000e+00> : vector<16x8xf32>
    %61 = tpu.matmul %60, %43, %cst_28 {dimension_numbers = #tpu.dot_dimension_numbers<[1], [0], [0], [1], [0, 0, 1, 1], [], []>} : vector<16x16xf32>, vector<16x8xf32>, vector<16x8xf32> -> vector<16x8xf32>
    %62 = vector.extract_strided_slice %38 {offsets = [0, 8], sizes = [16, 8], strides = [1, 1]} : vector<16x32xf32> to vector<16x8xf32>
    %63 = vector.extract_strided_slice %39 {offsets = [0, 8], sizes = [16, 8], strides = [1, 1]} : vector<16x32xf32> to vector<16x8xf32>
    %64 = vector.extract_strided_slice %40 {offsets = [0, 8], sizes = [16, 8], strides = [1, 1]} : vector<16x32xf32> to vector<16x8xf32>
    %cst_29 = arith.constant dense<0.000000e+00> : vector<16x16xf32>
    %65 = tpu.matmul %62, %63, %cst_29 {dimension_numbers = #tpu.dot_dimension_numbers<[1], [1], [0], [0], [0, 0, 1, 0], [], []>} : vector<16x8xf32>, vector<16x8xf32>, vector<16x16xf32> -> vector<16x16xf32>
    %cst_30 = arith.constant 0.353553385 : f32
    %66 = vector.broadcast %cst_30 : f32 to vector<16x16xf32>
    %67 = arith.mulf %65, %66 : vector<16x16xf32>
    %cst_31 = arith.constant 1.000000e+09 : f32
    %68 = vector.broadcast %cst_31 : f32 to vector<1x16xf32>
    %69 = arith.mulf %68, %3 : vector<1x16xf32>
    %70 = vector.broadcast %69 : vector<1x16xf32> to vector<16x16xf32>
    %71 = arith.subf %67, %70 : vector<16x16xf32>
    %cst_32 = arith.constant dense<0xFF800000> : vector<16xf32>
    %72 = vector.multi_reduction <maximumf>, %71, %cst_32 [1] : vector<16x16xf32> to vector<16xf32>
    %73 = vector.shape_cast %72 : vector<16xf32> to vector<16x1xf32>
    %74 = vector.broadcast %73 : vector<16x1xf32> to vector<16x16xf32>
    %75 = arith.subf %71, %74 : vector<16x16xf32>
    %76 = math.exp %75 : vector<16x16xf32>
    %cst_33 = arith.constant dense<0.000000e+00> : vector<16xf32>
    %77 = vector.multi_reduction <add>, %76, %cst_33 [1] : vector<16x16xf32> to vector<16xf32>
    %78 = vector.shape_cast %77 : vector<16xf32> to vector<16x1xf32>
    %79 = tpu.reciprocal %78 {approx = true} : vector<16x1xf32> -> vector<16x1xf32>
    %80 = vector.broadcast %79 : vector<16x1xf32> to vector<16x16xf32>
    %81 = arith.mulf %76, %80 : vector<16x16xf32>
    %cst_34 = arith.constant dense<0.000000e+00> : vector<16x8xf32>
    %82 = tpu.matmul %81, %64, %cst_34 {dimension_numbers = #tpu.dot_dimension_numbers<[1], [0], [0], [1], [0, 0, 1, 1], [], []>} : vector<16x16xf32>, vector<16x8xf32>, vector<16x8xf32> -> vector<16x8xf32>
    %83 = vector.extract_strided_slice %38 {offsets = [0, 16], sizes = [16, 8], strides = [1, 1]} : vector<16x32xf32> to vector<16x8xf32>
    %84 = vector.extract_strided_slice %39 {offsets = [0, 16], sizes = [16, 8], strides = [1, 1]} : vector<16x32xf32> to vector<16x8xf32>
    %85 = vector.extract_strided_slice %40 {offsets = [0, 16], sizes = [16, 8], strides = [1, 1]} : vector<16x32xf32> to vector<16x8xf32>
    %cst_35 = arith.constant dense<0.000000e+00> : vector<16x16xf32>
    %86 = tpu.matmul %83, %84, %cst_35 {dimension_numbers = #tpu.dot_dimension_numbers<[1], [1], [0], [0], [0, 0, 1, 0], [], []>} : vector<16x8xf32>, vector<16x8xf32>, vector<16x16xf32> -> vector<16x16xf32>
    %cst_36 = arith.constant 0.353553385 : f32
    %87 = vector.broadcast %cst_36 : f32 to vector<16x16xf32>
    %88 = arith.mulf %86, %87 : vector<16x16xf32>
    %cst_37 = arith.constant 1.000000e+09 : f32
    %89 = vector.broadcast %cst_37 : f32 to vector<1x16xf32>
    %90 = arith.mulf %89, %3 : vector<1x16xf32>
    %91 = vector.broadcast %90 : vector<1x16xf32> to vector<16x16xf32>
    %92 = arith.subf %88, %91 : vector<16x16xf32>
    %cst_38 = arith.constant dense<0xFF800000> : vector<16xf32>
    %93 = vector.multi_reduction <maximumf>, %92, %cst_38 [1] : vector<16x16xf32> to vector<16xf32>
    %94 = vector.shape_cast %93 : vector<16xf32> to vector<16x1xf32>
    %95 = vector.broadcast %94 : vector<16x1xf32> to vector<16x16xf32>
    %96 = arith.subf %92, %95 : vector<16x16xf32>
    %97 = math.exp %96 : vector<16x16xf32>
    %cst_39 = arith.constant dense<0.000000e+00> : vector<16xf32>
    %98 = vector.multi_reduction <add>, %97, %cst_39 [1] : vector<16x16xf32> to vector<16xf32>
    %99 = vector.shape_cast %98 : vector<16xf32> to vector<16x1xf32>
    %100 = tpu.reciprocal %99 {approx = true} : vector<16x1xf32> -> vector<16x1xf32>
    %101 = vector.broadcast %100 : vector<16x1xf32> to vector<16x16xf32>
    %102 = arith.mulf %97, %101 : vector<16x16xf32>
    %cst_40 = arith.constant dense<0.000000e+00> : vector<16x8xf32>
    %103 = tpu.matmul %102, %85, %cst_40 {dimension_numbers = #tpu.dot_dimension_numbers<[1], [0], [0], [1], [0, 0, 1, 1], [], []>} : vector<16x16xf32>, vector<16x8xf32>, vector<16x8xf32> -> vector<16x8xf32>
    %104 = vector.extract_strided_slice %38 {offsets = [0, 24], sizes = [16, 8], strides = [1, 1]} : vector<16x32xf32> to vector<16x8xf32>
    %105 = vector.extract_strided_slice %39 {offsets = [0, 24], sizes = [16, 8], strides = [1, 1]} : vector<16x32xf32> to vector<16x8xf32>
    %106 = vector.extract_strided_slice %40 {offsets = [0, 24], sizes = [16, 8], strides = [1, 1]} : vector<16x32xf32> to vector<16x8xf32>
    %cst_41 = arith.constant dense<0.000000e+00> : vector<16x16xf32>
    %107 = tpu.matmul %104, %105, %cst_41 {dimension_numbers = #tpu.dot_dimension_numbers<[1], [1], [0], [0], [0, 0, 1, 0], [], []>} : vector<16x8xf32>, vector<16x8xf32>, vector<16x16xf32> -> vector<16x16xf32>
    %cst_42 = arith.constant 0.353553385 : f32
    %108 = vector.broadcast %cst_42 : f32 to vector<16x16xf32>
    %109 = arith.mulf %107, %108 : vector<16x16xf32>
    %cst_43 = arith.constant 1.000000e+09 : f32
    %110 = vector.broadcast %cst_43 : f32 to vector<1x16xf32>
    %111 = arith.mulf %110, %3 : vector<1x16xf32>
    %112 = vector.broadcast %111 : vector<1x16xf32> to vector<16x16xf32>
    %113 = arith.subf %109, %112 : vector<16x16xf32>
    %cst_44 = arith.constant dense<0xFF800000> : vector<16xf32>
    %114 = vector.multi_reduction <maximumf>, %113, %cst_44 [1] : vector<16x16xf32> to vector<16xf32>
    %115 = vector.shape_cast %114 : vector<16xf32> to vector<16x1xf32>
    %116 = vector.broadcast %115 : vector<16x1xf32> to vector<16x16xf32>
    %117 = arith.subf %113, %116 : vector<16x16xf32>
    %118 = math.exp %117 : vector<16x16xf32>
    %cst_45 = arith.constant dense<0.000000e+00> : vector<16xf32>
    %119 = vector.multi_reduction <add>, %118, %cst_45 [1] : vector<16x16xf32> to vector<16xf32>
    %120 = vector.shape_cast %119 : vector<16xf32> to vector<16x1xf32>
    %121 = tpu.reciprocal %120 {approx = true} : vector<16x1xf32> -> vector<16x1xf32>
    %122 = vector.broadcast %121 : vector<16x1xf32> to vector<16x16xf32>
    %123 = arith.mulf %118, %122 : vector<16x16xf32>
    %cst_46 = arith.constant dense<0.000000e+00> : vector<16x8xf32>
    %124 = tpu.matmul %123, %106, %cst_46 {dimension_numbers = #tpu.dot_dimension_numbers<[1], [0], [0], [1], [0, 0, 1, 1], [], []>} : vector<16x16xf32>, vector<16x8xf32>, vector<16x8xf32> -> vector<16x8xf32>
    %125 = tpu.concatenate %61, %82, %103, %124 in 1 : vector<16x8xf32>, vector<16x8xf32>, vector<16x8xf32>, vector<16x8xf32> -> vector<16x32xf32>
    %c0_47 = arith.constant 0 : index
    %c0_48 = arith.constant 0 : index
    %126 = vector.load %arg9[%c0_47, %c0_48] : memref<32x32xf32, #tpu.memory_space<vmem>>, vector<32x32xf32>
    %cst_49 = arith.constant dense<0.000000e+00> : vector<16x32xf32>
    %127 = tpu.matmul %125, %126, %cst_49 {dimension_numbers = #tpu.dot_dimension_numbers<[1], [0], [0], [1], [0, 0, 1, 1], [], []>} : vector<16x32xf32>, vector<32x32xf32>, vector<16x32xf32> -> vector<16x32xf32>
    %c0_50 = arith.constant 0 : index
    %c0_51 = arith.constant 0 : index
    %128 = vector.load %arg10[%c0_50, %c0_51] : memref<1x32xf32, #tpu.memory_space<vmem>>, vector<1x32xf32>
    %129 = vector.broadcast %128 : vector<1x32xf32> to vector<16x32xf32>
    %130 = arith.addf %127, %129 : vector<16x32xf32>
    %131 = arith.addf %8, %130 : vector<16x32xf32>
    %c0_52 = arith.constant 0 : index
    %c0_53 = arith.constant 0 : index
    %132 = vector.load %arg11[%c0_52, %c0_53] : memref<1x32xf32, #tpu.memory_space<vmem>>, vector<1x32xf32>
    %c0_54 = arith.constant 0 : index
    %c0_55 = arith.constant 0 : index
    %133 = vector.load %arg12[%c0_54, %c0_55] : memref<1x32xf32, #tpu.memory_space<vmem>>, vector<1x32xf32>
    %cst_56 = arith.constant dense<0.000000e+00> : vector<16xf32>
    %134 = vector.multi_reduction <add>, %131, %cst_56 [1] : vector<16x32xf32> to vector<16xf32>
    %135 = vector.shape_cast %134 : vector<16xf32> to vector<16x1xf32>
    %cst_57 = arith.constant 3.200000e+01 : f32
    %136 = vector.broadcast %cst_57 : f32 to vector<16x1xf32>
    %137 = arith.divf %135, %136 : vector<16x1xf32>
    %138 = vector.broadcast %137 : vector<16x1xf32> to vector<16x32xf32>
    %139 = arith.subf %131, %138 : vector<16x32xf32>
    %140 = arith.mulf %139, %139 : vector<16x32xf32>
    %cst_58 = arith.constant dense<0.000000e+00> : vector<16xf32>
    %141 = vector.multi_reduction <add>, %140, %cst_58 [1] : vector<16x32xf32> to vector<16xf32>
    %142 = vector.shape_cast %141 : vector<16xf32> to vector<16x1xf32>
    %cst_59 = arith.constant 3.200000e+01 : f32
    %143 = vector.broadcast %cst_59 : f32 to vector<16x1xf32>
    %144 = arith.divf %142, %143 : vector<16x1xf32>
    %145 = vector.broadcast %137 : vector<16x1xf32> to vector<16x32xf32>
    %146 = arith.subf %131, %145 : vector<16x32xf32>
    %cst_60 = arith.constant 9.99999974E-6 : f32
    %147 = vector.broadcast %cst_60 : f32 to vector<16x1xf32>
    %148 = arith.addf %144, %147 : vector<16x1xf32>
    %149 = math.rsqrt %148 : vector<16x1xf32>
    %150 = vector.broadcast %149 : vector<16x1xf32> to vector<16x32xf32>
    %151 = arith.mulf %146, %150 : vector<16x32xf32>
    %152 = vector.broadcast %132 : vector<1x32xf32> to vector<16x32xf32>
    %153 = arith.mulf %151, %152 : vector<16x32xf32>
    %154 = vector.broadcast %133 : vector<1x32xf32> to vector<16x32xf32>
    %155 = arith.addf %153, %154 : vector<16x32xf32>
    %c0_61 = arith.constant 0 : index
    %c0_62 = arith.constant 0 : index
    %156 = vector.load %arg13[%c0_61, %c0_62] : memref<32x32xf32, #tpu.memory_space<vmem>>, vector<32x32xf32>
    %cst_63 = arith.constant dense<0.000000e+00> : vector<16x32xf32>
    %157 = tpu.matmul %155, %156, %cst_63 {dimension_numbers = #tpu.dot_dimension_numbers<[1], [0], [0], [1], [0, 0, 1, 1], [], []>} : vector<16x32xf32>, vector<32x32xf32>, vector<16x32xf32> -> vector<16x32xf32>
    %c0_64 = arith.constant 0 : index
    %c0_65 = arith.constant 0 : index
    %158 = vector.load %arg14[%c0_64, %c0_65] : memref<1x32xf32, #tpu.memory_space<vmem>>, vector<1x32xf32>
    %159 = vector.broadcast %158 : vector<1x32xf32> to vector<16x32xf32>
    %160 = arith.addf %157, %159 : vector<16x32xf32>
    %cst_66 = arith.constant 5.000000e-01 : f32
    %161 = vector.broadcast %cst_66 : f32 to vector<16x32xf32>
    %162 = arith.mulf %161, %160 : vector<16x32xf32>
    %cst_67 = arith.constant 0.707106769 : f32
    %163 = vector.broadcast %cst_67 : f32 to vector<16x32xf32>
    %164 = arith.mulf %160, %163 : vector<16x32xf32>
    %165 = math.erf %164 : vector<16x32xf32>
    %cst_68 = arith.constant 1.000000e+00 : f32
    %166 = vector.broadcast %cst_68 : f32 to vector<16x32xf32>
    %167 = arith.addf %166, %165 : vector<16x32xf32>
    %168 = arith.mulf %162, %167 : vector<16x32xf32>
    %c0_69 = arith.constant 0 : index
    %c0_70 = arith.constant 0 : index
    %169 = vector.load %arg15[%c0_69, %c0_70] : memref<32x32xf32, #tpu.memory_space<vmem>>, vector<32x32xf32>
    %cst_71 = arith.constant dense<0.000000e+00> : vector<16x32xf32>
    %170 = tpu.matmul %168, %169, %cst_71 {dimension_numbers = #tpu.dot_dimension_numbers<[1], [0], [0], [1], [0, 0, 1, 1], [], []>} : vector<16x32xf32>, vector<32x32xf32>, vector<16x32xf32> -> vector<16x32xf32>
    %c0_72 = arith.constant 0 : index
    %c0_73 = arith.constant 0 : index
    %171 = vector.load %arg16[%c0_72, %c0_73] : memref<1x32xf32, #tpu.memory_space<vmem>>, vector<1x32xf32>
    %172 = vector.broadcast %171 : vector<1x32xf32> to vector<16x32xf32>
    %173 = arith.addf %170, %172 : vector<16x32xf32>
    %174 = arith.addf %131, %173 : vector<16x32xf32>
    %c0_74 = arith.constant 0 : index
    %c0_75 = arith.constant 0 : index
    %175 = vector.load %arg17[%c0_74, %c0_75] : memref<32x128xf32, #tpu.memory_space<vmem>>, vector<32x128xf32>
    %cst_76 = arith.constant dense<0.000000e+00> : vector<16x128xf32>
    %176 = tpu.matmul %174, %175, %cst_76 {dimension_numbers = #tpu.dot_dimension_numbers<[1], [0], [0], [1], [0, 0, 1, 1], [], []>} : vector<16x32xf32>, vector<32x128xf32>, vector<16x128xf32> -> vector<16x128xf32>
    %c0_77 = arith.constant 0 : index
    %c0_78 = arith.constant 0 : index
    %177 = vector.load %arg18[%c0_77, %c0_78] : memref<1x128xf32, #tpu.memory_space<vmem>>, vector<1x128xf32>
    %178 = vector.broadcast %177 : vector<1x128xf32> to vector<16x128xf32>
    %179 = arith.addf %176, %178 : vector<16x128xf32>
    %cst_79 = arith.constant 1.000000e+00 : f32
    %180 = vector.broadcast %cst_79 : f32 to vector<1x16xf32>
    %181 = arith.subf %180, %3 : vector<1x16xf32>
    %cst_80 = arith.constant dense<0.000000e+00> : vector<1x128xf32>
    %182 = tpu.matmul %181, %179, %cst_80 {dimension_numbers = #tpu.dot_dimension_numbers<[1], [0], [0], [1], [0, 0, 1, 1], [], []>} : vector<1x16xf32>, vector<16x128xf32>, vector<1x128xf32> -> vector<1x128xf32>
    %c0_81 = arith.constant 0 : index
    %c0_82 = arith.constant 0 : index
    %c0_83 = arith.constant 0 : index
    %183 = vector.load %arg19[%c0_81, %c0_82, %c0_83] : memref<1x1x128xf32, #tpu.memory_space<vmem>>, vector<1x1x128xf32>
    %184 = vector.shape_cast %183 : vector<1x1x128xf32> to vector<1x128xf32>
    %185 = vector.shape_cast %182 : vector<1x128xf32> to vector<1x1x128xf32>
    tpu.vector_store %arg19[%c0_81, %c0_82, %c0_83], %185 {strides = array<i32>} : memref<1x1x128xf32, #tpu.memory_space<vmem>>, vector<1x1x128xf32>,
    return
  }
  func.func @transform_0(%arg0: i32) -> (i32, i32, i32) {
    %c0_i32 = arith.constant 0 : i32
    %c0_i32_0 = arith.constant 0 : i32
    %c0_i32_1 = arith.constant 0 : i32
    return %arg0, %c0_i32, %c0_i32_0 : i32, i32, i32
  }
  func.func @transform_1(%arg0: i32) -> (i32, i32, i32) {
    %c0_i32 = arith.constant 0 : i32
    %c0_i32_0 = arith.constant 0 : i32
    %c0_i32_1 = arith.constant 0 : i32
    return %arg0, %c0_i32, %c0_i32_0 : i32, i32, i32
  }
  func.func @transform_2(%arg0: i32) -> (i32, i32) {
    %c0_i32 = arith.constant 0 : i32
    %c0_i32_0 = arith.constant 0 : i32
    %c0_i32_1 = arith.constant 0 : i32
    return %c0_i32, %c0_i32_0 : i32, i32
  }
  func.func @transform_3(%arg0: i32) -> (i32, i32) {
    %c0_i32 = arith.constant 0 : i32
    %c0_i32_0 = arith.constant 0 : i32
    %c0_i32_1 = arith.constant 0 : i32
    return %c0_i32, %c0_i32_0 : i32, i32
  }
  func.func @transform_4(%arg0: i32) -> (i32, i32) {
    %c0_i32 = arith.constant 0 : i32
    %c0_i32_0 = arith.constant 0 : i32
    %c0_i32_1 = arith.constant 0 : i32
    return %c0_i32, %c0_i32_0 : i32, i32
  }
  func.func @transform_5(%arg0: i32) -> (i32, i32) {
    %c0_i32 = arith.constant 0 : i32
    %c0_i32_0 = arith.constant 0 : i32
    %c0_i32_1 = arith.constant 0 : i32
    return %c0_i32, %c0_i32_0 : i32, i32
  }
  func.func @transform_6(%arg0: i32) -> (i32, i32) {
    %c0_i32 = arith.constant 0 : i32
    %c0_i32_0 = arith.constant 0 : i32
    %c0_i32_1 = arith.constant 0 : i32
    return %c0_i32, %c0_i32_0 : i32, i32
  }
  func.func @transform_7(%arg0: i32) -> (i32, i32) {
    %c0_i32 = arith.constant 0 : i32
    %c0_i32_0 = arith.constant 0 : i32
    %c0_i32_1 = arith.constant 0 : i32
    return %c0_i32, %c0_i32_0 : i32, i32
  }
  func.func @transform_8(%arg0: i32) -> (i32, i32) {
    %c0_i32 = arith.constant 0 : i32
    %c0_i32_0 = arith.constant 0 : i32
    %c0_i32_1 = arith.constant 0 : i32
    return %c0_i32, %c0_i32_0 : i32, i32
  }
  func.func @transform_9(%arg0: i32) -> (i32, i32) {
    %c0_i32 = arith.constant 0 : i32
    %c0_i32_0 = arith.constant 0 : i32
    %c0_i32_1 = arith.constant 0 : i32
    return %c0_i32, %c0_i32_0 : i32, i32
  }
  func.func @transform_10(%arg0: i32) -> (i32, i32) {
    %c0_i32 = arith.constant 0 : i32
    %c0_i32_0 = arith.constant 0 : i32
    %c0_i32_1 = arith.constant 0 : i32
    return %c0_i32, %c0_i32_0 : i32, i32
  }
  func.func @transform_11(%arg0: i32) -> (i32, i32) {
    %c0_i32 = arith.constant 0 : i32
    %c0_i32_0 = arith.constant 0 : i32
    %c0_i32_1 = arith.constant 0 : i32
    return %c0_i32, %c0_i32_0 : i32, i32
  }
  func.func @transform_12(%arg0: i32) -> (i32, i32) {
    %c0_i32 = arith.constant 0 : i32
    %c0_i32_0 = arith.constant 0 : i32
    %c0_i32_1 = arith.constant 0 : i32
    return %c0_i32, %c0_i32_0 : i32, i32
  }
  func.func @transform_13(%arg0: i32) -> (i32, i32) {
    %c0_i32 = arith.constant 0 : i32
    %c0_i32_0 = arith.constant 0 : i32
    %c0_i32_1 = arith.constant 0 : i32
    return %c0_i32, %c0_i32_0 : i32, i32
  }
  func.func @transform_14(%arg0: i32) -> (i32, i32) {
    %c0_i32 = arith.constant 0 : i32
    %c0_i32_0 = arith.constant 0 : i32
    %c0_i32_1 = arith.constant 0 : i32
    return %c0_i32, %c0_i32_0 : i32, i32
  }
  func.func @transform_15(%arg0: i32) -> (i32, i32) {
    %c0_i32 = arith.constant 0 : i32
    %c0_i32_0 = arith.constant 0 : i32
    %c0_i32_1 = arith.constant 0 : i32
    return %c0_i32, %c0_i32_0 : i32, i32
  }
  func.func @transform_16(%arg0: i32) -> (i32, i32) {
    %c0_i32 = arith.constant 0 : i32
    %c0_i32_0 = arith.constant 0 : i32
    %c0_i32_1 = arith.constant 0 : i32
    return %c0_i32, %c0_i32_0 : i32, i32
  }
  func.func @transform_17(%arg0: i32) -> (i32, i32) {
    %c0_i32 = arith.constant 0 : i32
    %c0_i32_0 = arith.constant 0 : i32
    %c0_i32_1 = arith.constant 0 : i32
    return %c0_i32, %c0_i32_0 : i32, i32
  }
  func.func @transform_18(%arg0: i32) -> (i32, i32, i32) {
    %c0_i32 = arith.constant 0 : i32
    %c0_i32_0 = arith.constant 0 : i32
    %c0_i32_1 = arith.constant 0 : i32
    return %arg0, %c0_i32, %c0_i32_0 : i32, i32, i32
  }
}

</mosaic_0001>

<bundles_post_ra>
// kernel: tpu_custom_call.1
= control target key start
LH: loop header
LB: loop body
LE: loop exit
PB: predicated region body
PF: predicated region fallthrough
CT: control target
= control target key end

     0   :  { %s2577_s0 = inlined_call_operand.vmem [shape: f32[2,16,33], index: 0, kind: input, shape index: {}]   ;;  %s2578_s1 = inlined_call_operand.vmem [shape: f32[2,1,16], index: 1, kind: input, shape index: {}]   ;;  %s2579_s2 = inlined_call_operand.vmem [shape: f32[33,32], index: 2, kind: input, shape index: {}]   ;;  %s2580_s3 = inlined_call_operand.vmem [shape: f32[1,32], index: 3, kind: input, shape index: {}]   ;;  %s2581_s4 = inlined_call_operand.vmem [shape: f32[1,32], index: 4, kind: input, shape index: {}]   ;;  %s2582_s5 = inlined_call_operand.vmem [shape: f32[1,32], index: 5, kind: input, shape index: {}]   ;;  %s2583_s6 = inlined_call_operand.vmem [shape: f32[32,96], index: 6, kind: input, shape index: {}]   ;;  %s2584_s7 = inlined_call_operand.vmem [shape: f32[1,96], index: 7, kind: input, shape index: {}]   ;;  %s2585_s8 = inlined_call_operand.hbm [shape: f32[32,32], index: 8, kind: input, shape index: {}]   ;;  %s2586_s9 = inlined_call_operand.vmem [shape: f32[1,32], index: 9, kind: input, shape index: {}]   ;;  %s2587_s10 = inlined_call_operand.vmem [shape: f32[1,32], index: 10, kind: input, shape index: {}]   ;;  %s2588_s11 = inlined_call_operand.vmem [shape: f32[1,32], index: 11, kind: input, shape index: {}]   ;;  %s2589_s12 = inlined_call_operand.hbm [shape: f32[32,32], index: 12, kind: input, shape index: {}]   ;;  %s2590_s13 = inlined_call_operand.vmem [shape: f32[1,32], index: 13, kind: input, shape index: {}]   ;;  %s2591_s14 = inlined_call_operand.hbm [shape: f32[32,32], index: 14, kind: input, shape index: {}]   ;;  %s2592_s15 = inlined_call_operand.vmem [shape: f32[1,32], index: 15, kind: input, shape index: {}]   ;;  %s2593_s16 = inlined_call_operand.hbm [shape: f32[32,128], index: 16, kind: input, shape index: {}]   ;;  %s2594_s17 = inlined_call_operand.vmem [shape: f32[1,128], index: 17, kind: input, shape index: {}]   ;;  %s2595_s18 = inlined_call_operand.hbm [shape: f32[2,1,128], index: 18, kind: output, shape index: {}]  }
   0x1   :  { %2606 = sst [smem:[#allocation22_spill]] %s2577_s0 }
   0x2   :  { %2607 = sst [smem:[#allocation23_spill]] %s2578_s1 }
   0x3   :  { %2608 = sst [smem:[#allocation24_spill]] %s2579_s2 }
   0x4   :  { %2609 = sst [smem:[#allocation25_spill]] %s2585_s8 }
   0x5   :  { %2610 = sst [smem:[#allocation26_spill]] %s2589_s12 }
   0x6   :  { %2611 = sst [smem:[#allocation27_spill]] %s2594_s17 }
   0x7   :  { %2612 = sst [smem:[#allocation28_spill]] %s2595_s18 }
   0x8   :  { %23 = vsyncpa [#allocation3], 0 }
   0x9   :  { %24 = vsyncpa [#allocation6], 0 }
   0xa   :  { %25 = vsyncpa [#allocation9], 0 }
   0xb   :  { %26 = vsyncpa [#allocation4], 0 }
   0xc   :  { %28 = vsyncpa [#allocation4 + $0x1], 0  ;;  %s2221_s27 = smov 0   ;;  %s2223_s28 = smov 0  }
   0xd   :  { %s2225_s29 = smov 0   ;;  %s2227_s30 = smov 0  }
   0xe LB: > { %2613 = sst [smem:[#allocation15_spill]] %s2091_s27  ;;  %s2242_s0 = sadd.s32 4294967295, %s2103_s30   ;;  %s2103_s30 = sphi %s2227_s30, %s2636_s30   ;;  %s2099_s29 = sphi %s2225_s29, %s2638_s29   ;;  %s2095_s28 = sphi %s2223_s28, %s2640_s28   ;;  %s2091_s27 = sphi %s2221_s27, %s2639_s27  }
   0xf   : > { %2614 = sst [smem:[#allocation16_spill]] %s2099_s29  ;;  %s1675_s19 = sadd.s32 4294967294, %s2103_s30  }
  0x10   : > { %2615 = sst [smem:[#allocation17_spill]] %s2103_s30  ;;  %s2246_s1 = sadd.s32 1, %s2103_s30  }
  0x11   : > { %2616 = sst [smem:[#allocation18_spill]] %s2246_s1  ;;  %s429_s20 = sadd.s32 1, %s2099_s29 }
  0x12   : > { %s426_s21 = ssub.s32 %s2103_s30, %s2246_s1  ;;  %p439_p0 = scmp.ne.s32.totalorder %s2099_s29, %s2095_s28 }
  0x13   : > { %p427_p1 = scmp.eq.s32.totalorder %s426_s21, 0  ;;  %p440_p2 = scmp.eq.s32.totalorder %s2242_s0, 1 }
  0x14   : > { %p445_p3 = scmp.ne.s32.totalorder %s2095_s28, %s2091_s27  ;;  %p446_p4 = scmp.eq.s32.totalorder %s1675_s19, 1 }
  0x15   : > { %s2257_s22 = scalar_select %p427_p1, %s2099_s29, %s429_s20  }
  0x16   : > { %p2259_p5 = por %p440_p2, %p439_p0  ;;  %p2263_p6 = por %p446_p4, %p445_p3 }
  0x17   : > { %2617 = sst [smem:[#allocation19_spill]] %s2257_s22  ;;  %p1676_p7 = scmp.ge.s32.totalorder %s2103_s30, 1 }
  0x18   : > { %s2618_s2 = scalar_select %p2259_p5, 1, 0 }
  0x19   : > { %s2620_s23 = scalar_select %p2263_p6, 1, 0 }
  0x1a   : > { %2619 = sst [smem:[#allocation20_spill]] %s2618_s2  ;;  %p453_p8 = scmp.lt.s32.totalorder %s2103_s30, 3 }
  0x1b   : > { %2621 = sst [smem:[#allocation21_spill]] %s2620_s23  ;;  %p1771_p9 = scmp.eq.s32.totalorder %s2242_s0, 0 }
  0x1c   : > { %p2270_p10 = pnand %p1676_p7, %p453_p8  ;;  %s2623_s12 = sld [smem:[#allocation26_spill]] }
  0x1d   : > { %s2624_s8 = sld [smem:[#allocation25_spill]]  ;;  %s2105_s1 = smov [#allocation5]  }
  0x1e   : > { %p1754_p11 = pneg %p2270_p10  ;;  %s507_s23 = sshll.u32 %s2105_s1, 4  ;;  %s508_s23 = int_to_ptr.vmem [resolvable:$true] %s507_s23 }
  0x1f   : > { %s2106_s25 = smov 128   ;;  %s2107_s26 = smov 8  }
  0x20   : > { %p2284_p12 = pnand %p1771_p9, %p1754_p11  ;;  %s522_s27 = sshll.u32 %s2591_s14, 4  ;;  %s523_s27 = int_to_ptr.hbm [resolvable:$true] %s522_s27 }
  0x21   : > { %s539_s18 = sshll.u32 %s2593_s16, 4  ;;  %s2109_s2 = smov [#allocation7]   ;;  %s540_s18 = int_to_ptr.hbm [resolvable:$true] %s539_s18 }
  0x22   : > { %s505_s19 = sshll.u32 %s2623_s12, 4  ;;  %s2108_s12 = smov [#allocation2]   ;;  %s506_s19 = int_to_ptr.hbm [resolvable:$true] %s505_s19 }
  0x23   : > { %s482_s22 = sshll.u32 %s2624_s8, 4  ;;  %s484_s20 = sshll.u32 %s2108_s12, 4  ;;  %s483_s22 = int_to_ptr.hbm [resolvable:$true] %s482_s22  ;;  %s485_s20 = int_to_ptr.vmem [resolvable:$true] %s484_s20 }
  0x24   : > { %1760 = dma.hbm_to_vmem [thread:$0]  (!%p2284_p12), %s506_s19, 512, %s508_s23, [#allocation6], %s2106_s25, %s2106_s25, %s2107_s26  }
  0x25   : > { %1757 = dma.hbm_to_vmem [thread:$0]  (!%p2284_p12), %s483_s22, 512, %s485_s20, [#allocation3], %s2106_s25, %s2106_s25, %s2107_s26  }
  0x26   : > { %s524_s17 = sshll.u32 %s2109_s2, 4  ;;  %s2110_s23 = smov [#allocation8]   ;;  %s525_s17 = int_to_ptr.vmem [resolvable:$true] %s524_s17 }
  0x27   : > { %1763 = dma.hbm_to_vmem [thread:$0]  (!%p2284_p12), %s523_s27, 512, %s525_s17, [#allocation6], %s2106_s25, %s2106_s25, %s2107_s26  }
  0x28   : > { %s541_s12 = sshll.u32 %s2110_s23, 4  ;;  %574 = sbr.rel (%p2270_p10) target bundleno = 2754 (0xac2), region = 92  ;;  %s542_s12 = int_to_ptr.vmem [resolvable:$true] %s541_s12 }
  0x29   : > { %1766 = dma.hbm_to_vmem [thread:$0]  (!%p2284_p12), %s540_s18, 512, %s542_s12, [#allocation9], %s2106_s25, %s2106_s25, %s2107_s26  }
  0x2d   : > { %2074 = dma.done.wait (%p1771_p9), [#allocation3], 512  }
  0x2e   : > { %2076 = vsyncadd (%p1771_p9), [#allocation3], 4294966784 }
  0x2f   : > { %2078 = dma.done.wait (%p1771_p9), [#allocation6], 1024  }
  0x30   : > { %2080 = vsyncadd (%p1771_p9), [#allocation6], 4294966272 }
  0x31   : > { %2082 = dma.done.wait (%p1771_p9), [#allocation9], 512  }
  0x32   : > { %2084 = vsyncadd (%p1771_p9), [#allocation9], 4294966784  ;;  %p646_p13 = scmp.lt.s32.totalorder %s2242_s0, 1  ;;  %vm673_vm0 = vcmask 1040384   ;;  %s2626_s27 = sld [smem:[#allocation24_spill]]  ;;  %vm666_vm1 = vcmask 269312  }
  0x33   : > { %s2628_s1 = sld [smem:[#allocation22_spill]]  ;;  %v1853_v8 = vld [vmem:[%s2580_s3] ss:$0 sm:$0xff]  ;;  %vm702_vm2 = vcmask 261120   ;;  %v2111_v14 = vmov 32.0   ;;  %v767_v31 = vld [vmem:[%s2583_s6 + $0x18] sm:$0xff] }
  0x34   : > { %s2318_s8 = scalar_select %p646_p13, %s2242_s0, 1  ;;  %1863 = vrcp.f32 %v2111_v14  ;;  %1732 = vmatpush.msra.mxu1 %v767_v31  ;;  %v766_v32 = vld [vmem:[%s2583_s6 + $0x10] sm:$0xff]  ;;  %v765_v33 = vld [vmem:[%s2583_s6 + $0x8] sm:$0xff]  ;;  %v764_v34 = vld [vmem:[%s2583_s6] sm:$0xff]  ;;  %vm807_vm10 = vcmask 64512   ;;  %vm847_vm11 = vcmask 130048  }
  0x35   : > { %v1854_v49 = vld [vmem:[%s2581_s4] ss:$0 sm:$0xff]  ;;  %s2113_s29 = smov 88   ;;  %s2114_s30 = smov 120   ;;  %vm1233_vm12 = vcmask 195584  }
  0x36   : > { %s1731_s2 = sshll.u32 %s2318_s8, 4  ;;  %1733 = vmatpush.msra.mxu1 %v766_v32  ;;  %v1855_v53 = vld [vmem:[%s2582_s5] ss:$0 sm:$0xff]  ;;  %s2629_s19 = sld [smem:[#allocation23_spill]] }
  0x37   : > { %v1856_v63 = vld [vmem:[%s2584_s7] ss:$0 sm:$0xff]  ;;  %s2116_s26 = smov 80   ;;  %s2117_s20 = smov 112  }
  0x38   : > { %s2627_s22 = smov %s2626_s27  ;;  %v661_v0 = vld [vmem:[%s2626_s27 + $0x20] sm:$0x1]  ;;  %1734 = vmatpush.msra.mxu1 %v765_v33  ;;  %s2112_s27 = smov 96  }
  0x39   : > { %v660_v1 = vld [vmem:[%s2627_s22 + $0x18] sm:$0xff]  ;;  %1689 = vmatpush.msk.msra.mxu0 %vm673_vm0, %v661_v0  ;;  %v659_v2 = vld [vmem:[%s2627_s22 + $0x10] sm:$0xff]  ;;  %v658_v3 = vld [vmem:[%s2627_s22 + $0x8] sm:$0xff]  ;;  %s650_s23 = scalar_lea.vmem %s2628_s1, %s1731_s2  ;;  %s2118_s21 = smov 72  }
  0x3a   : > { %v657_v4 = vld [vmem:[%s2627_s22] sm:$0xff]  ;;  %v655_v6 = vld [vmem:[%s650_s23 + $0x8] sm:$0xff]  ;;  %v1864_v15 = vpop.eup %1863  ;;  %1735 = vmatpush.msra.mxu1 %v764_v34  ;;  %s2119_s1 = smov 104   ;;  %s2121_s12 = smov 40  }
  0x3b   : > { %689 = vmatpush.msra.mxu0 %v660_v1  ;;  %v654_v5 = vld [vmem:[%s650_s23] sm:$0xff]  ;;  %v710_v16 = vmul.f32 32.0, %v1864_v15  ;;  %vm714_vm3 = vweird.f32 %v1864_v15  ;;  %s2120_s23 = smov 56   ;;  %s2122_s17 = smov 48  }
  0x3c   : > { %s653_s25 = scalar_lea.vmem %s2629_s19, %s2318_s8  ;;  %s2115_s8 = smov 64  }
  0x3d   : > { %690 = vmatpush.msra.mxu0 %v659_v2  ;;  %v711_v17 = vsub.f32 1.0, %v710_v16  ;;  %s2123_s18 = smov 8   ;;  %s2632_s2 = sld [smem:[#allocation28_spill]] }
  0x3f   : > { %691 = vmatpush.msra.mxu0 %v658_v3  ;;  %v712_v18 = vmul.f32 %v1864_v15, %v711_v17 }
  0x41   : > { %692 = vmatpush.msra.mxu0 %v657_v4  ;;  %v713_v19 = vadd.f32 %v1864_v15, %v712_v18 }
  0x42   : > { %1690 = vmatmul.msk.f32.vlgmr.msra.gmra.mxu0 %vm666_vm1, %v654_v5 }
  0x43   : > { %v2350_v20 = vsel %vm714_vm3, %v1864_v15, %v713_v19  ;;  %790 = vmatpush.msrb.mxu0 %v767_v31  ;;  %s1566_s24 = scalar_lea.hbm %s2632_s2, %s2242_s0 }
  0x45   : > { %791 = vmatpush.msrb.mxu0 %v766_v32 }
  0x47   : > { %792 = vmatpush.msrb.mxu0 %v765_v33 }
  0x49   : > { %793 = vmatpush.msrb.mxu0 %v764_v34 }
  0x4a   : > { %1691 = vmatmul.msk.f32.gmra.mxu0 %vm666_vm1, %v655_v6  ;;  %v2399_v6 = vld [vmem:[%s653_s25] sm:$0x1] }
  0xbf   : > { %v694_v7 = vpop.f32.mrf.mxu0 }
  0xc0   : > { %v2346_v12 = vadd.f32 %v1853_v8, %v694_v7  ;;  %v841_v7 = vmul.f32 1e+09, %v2399_v6 }
  0xc2   : > { %v703_v13 = vsel %vm702_vm2, %v2346_v12, 0.0 }
  0xc7   : > { %v697_v9 = vpop.f32.mrf.mxu0 }
  0xc8   : > { %v2342_v10 = vadd.f32 %v1853_v8, %v697_v9  ;;  %v2402_v8 = vperm.slane %v841_v7, 0 }
  0xca   : > { %v706_v11 = vsel %vm702_vm2, %v2342_v10, 0.0 }
  0xcb   : > { %707 = vadd.xlane.f32.xlu0 %v706_v11 }
  0xd3   : > { %704 = vadd.xlane.f32.xlu0 %v703_v13 }
 0x13e   : > { %v708_v21 = vpop.xlane.xlu0 %707 }
 0x13f   : > { %v717_v22 = vmul.f32 %v2350_v20, %v708_v21 }
 0x141   : > { %v719_v23 = vsub.f32 %v2342_v10, %v717_v22 }
 0x143   : > { %v721_v24 = vmul.f32 %v719_v23, %v719_v23 }
 0x145   : > { %v725_v25 = vsel %vm702_vm2, %v721_v24, 0.0 }
 0x146   : > { %726 = vadd.xlane.f32.xlu1 %v725_v25  ;;  %v705_v26 = vpop.xlane.xlu0 %704 }
 0x147   : > { %v716_v27 = vmul.f32 %v2350_v20, %v705_v26 }
 0x149   : > { %v718_v28 = vsub.f32 %v2346_v12, %v716_v27 }
 0x14b   : > { %v720_v29 = vmul.f32 %v718_v28, %v718_v28 }
 0x14d   : > { %v722_v30 = vsel %vm702_vm2, %v720_v29, 0.0 }
 0x14e   : > { %723 = vadd.xlane.f32.xlu1 %v722_v30 }
 0x1b9   : > { %v727_v35 = vpop.xlane.xlu1 %726 }
 0x1ba   : > { %v729_v36 = vmul.f32 %v727_v35, %v2350_v20 }
 0x1bc   : > { %v731_v37 = vadd.f32 1e-05, %v729_v36 }
 0x1be   : > { %1865 = vrsqrt.f32 %v731_v37  ;;  %vm748_vm5 = vweird.f32 %v731_v37 }
 0x1c1   : > { %v724_v38 = vpop.xlane.xlu1 %723 }
 0x1c2   : > { %v728_v39 = vmul.f32 %v724_v38, %v2350_v20 }
 0x1c4   : > { %v1866_v40 = vpop.eup %1865  ;;  %v730_v41 = vadd.f32 1e-05, %v728_v39 }
 0x1c5   : > { %v743_v42 = vmul.f32 %v1866_v40, %v731_v37  ;;  %vm749_vm4 = vweird.f32 %v1866_v40 }
 0x1c6   : > { %1867 = vrsqrt.f32 %v730_v41  ;;  %vm750_vm6 = vmor %vm748_vm5, %vm749_vm4  ;;  %vm738_vm8 = vweird.f32 %v730_v41 }
 0x1c7   : > { %v744_v43 = vmul.f32 %v1866_v40, %v743_v42 }
 0x1c9   : > { %v745_v44 = vmul.f32 0.5, %v744_v43 }
 0x1cb   : > { %v746_v45 = vsub.f32 1.5, %v745_v44 }
 0x1cc   : > { %v1868_v46 = vpop.eup %1867 }
 0x1cd   : > { %v747_v47 = vmul.f32 %v1866_v40, %v746_v45  ;;  %v733_v48 = vmul.f32 %v1868_v46, %v730_v41  ;;  %vm739_vm7 = vweird.f32 %v1868_v46 }
 0x1ce   : > { %vm740_vm9 = vmor %vm738_vm8, %vm739_vm7 }
 0x1cf   : > { %v751_v50 = vsel %vm750_vm6, %v1866_v40, %v747_v47  ;;  %v734_v51 = vmul.f32 %v1868_v46, %v733_v48 }
 0x1d0   : > { %v753_v52 = vmul.f32 %v751_v50, %v719_v23 }
 0x1d1   : > { %v735_v54 = vmul.f32 0.5, %v734_v51 }
 0x1d2   : > { %v758_v55 = vmul.f32 %v1854_v49, %v753_v52 }
 0x1d3   : > { %v736_v56 = vsub.f32 1.5, %v735_v54 }
 0x1d4   : > { %v763_v57 = vadd.f32 %v1855_v53, %v758_v55 }
 0x1d5   : > { %v737_v58 = vmul.f32 %v1868_v46, %v736_v56 }
 0x1d6   : > { %1693 = vmatmul.msk.f32.vlgmr.msra.gmra.mxu1 %vm702_vm2, %v763_v57 }
 0x1d7   : > { %v741_v59 = vsel %vm740_vm9, %v1868_v46, %v737_v58 }
 0x1d8   : > { %v752_v60 = vmul.f32 %v741_v59, %v718_v28 }
 0x1da   : > { %v757_v61 = vmul.f32 %v1854_v49, %v752_v60 }
 0x1dc   : > { %v762_v62 = vadd.f32 %v1855_v53, %v757_v61 }
 0x1de   : > { %1692 = vmatmul.msk.f32.vlgmr.msrb.gmra.mxu0 %vm702_vm2, %v762_v62 }
 0x253   : > { %v798_v0 = vpop.f32.mrf.mxu1 }
 0x254   : > { %v2383_v1 = vadd.f32 %v1856_v63, %v798_v0 }
 0x256   : > { %805 = vrot.lane.b32.xlu2 %v2383_v1, %s2112_s27  ;;  %911 = vrot.lane.b32.xlu1 %v2383_v1, %s2113_s29 }
 0x25b   : > { %v795_v2 = vpop.f32.mrf.mxu0 }
 0x25c   : > { %v796_v3 = vadd.f32 %v1856_v63, %v795_v2 }
 0x25e   : > { %907 = vrot.lane.b32.xlu1 %v2383_v1, %s2114_s30  ;;  %803 = vrot.lane.b32.xlu2 %v796_v3, %s2112_s27  ;;  %v2409_v19 = vpack.i.bf16 %v796_v3, %v2383_v1  ;;  %s2124_s27 = smov 16  }
 0x2b0   : > { %v806_v4 = vpop.permute.xlu2 %805 }
 0x2b1   : > { %1694 = vmatpush.xpose.msk.msra.mxu2 %vm807_vm10, %v806_v4 }
 0x2b8   : > { %v804_v5 = vpop.permute.xlu2 %803 }
 0x2b9   : > { %1695 = vmatpush.xpose.msk.msra.mxu2 %vm807_vm10, %v804_v5 }
 0x2bc   : > { %1696 = vmatmul.msk.f32.vlgmr.msra.gmra.mxu2 %vm807_vm10, %v796_v3 }
 0x2c4   : > { %1697 = vmatmul.msk.f32.gmra.mxu2 %vm807_vm10, %v2383_v1 }
 0x2c8   : > { %v912_v21 = vpop.permute.xlu1 %911 }
 0x2d0   : > { %v908_v22 = vpop.permute.xlu1 %907 }
 0x33f   : > { %v833_v9 = vpop.f32.mrf.mxu2 }
 0x340   : > { %v839_v11 = vmul.f32 0.35355338, %v833_v9 }
 0x342   : > { %v845_v13 = vsub.f32 %v839_v11, %v2402_v8 }
 0x344   : > { %v848_v14 = vsel %vm847_vm11, %v845_v13, -inf }
 0x345   : > { %849 = vmax.xlane.f32.xlu0 %v848_v14 }
 0x347   : > { %v836_v15 = vpop.f32.mrf.mxu2 }
 0x348   : > { %v840_v16 = vmul.f32 0.35355338, %v836_v15 }
 0x34a   : > { %v846_v17 = vsub.f32 %v840_v16, %v2402_v8 }
 0x34c   : > { %v851_v18 = vsel %vm847_vm11, %v846_v17, -inf }
 0x34d   : > { %852 = vmax.xlane.f32.xlu1 %v851_v18 }
 0x359   : > { %1834 = vrot.lane.b32.xlu0 %v2409_v19, %s2115_s8  ;;  %s1570_s8 = sshll.u32 %s1566_s24, 4  ;;  %s1571_s8 = int_to_ptr.hbm [resolvable:$true] %s1570_s8 }
 0x361   : > { %909 = vrot.lane.b32.xlu0 %v796_v3, %s2113_s29  ;;  %s2125_s29 = smov 24  }
 0x366   : > { %1009 = vrot.lane.b32.xlu1 %v796_v3, %s2116_s26 }
 0x369   : > { %905 = vrot.lane.b32.xlu0 %v796_v3, %s2114_s30 }
 0x36e   : > { %1005 = vrot.lane.b32.xlu1 %v796_v3, %s2117_s20 }
 0x371   : > { %1111 = vrot.lane.b32.xlu0 %v2383_v1, %s2118_s21 }
 0x379   : > { %1109 = vrot.lane.b32.xlu0 %v796_v3, %s2118_s21 }
 0x381   : > { %1105 = vrot.lane.b32.xlu0 %v796_v3, %s2119_s1 }
 0x3b8   : > { %v850_v23 = vpop.xlane.xlu0 %849 }
 0x3b9   : > { %v854_v24 = vsub.f32 %v845_v13, %v850_v23 }
 0x3bb   : > { %v856_v25 = vmul.f32 1.442695, %v854_v24 }
 0x3bd   : > { %1869 = vpow2.f32 %v856_v25 }
 0x3c0   : > { %v853_v26 = vpop.xlane.xlu1 %852 }
 0x3c1   : > { %v855_v27 = vsub.f32 %v846_v17, %v853_v26 }
 0x3c3   : > { %v1870_v28 = vpop.eup %1869  ;;  %v858_v29 = vmul.f32 1.442695, %v855_v27 }
 0x3c4   : > { %v860_v30 = vsel %vm847_vm11, %v1870_v28, 0.0 }
 0x3c5   : > { %1871 = vpow2.f32 %v858_v29  ;;  %861 = vadd.xlane.f32.xlu2 %v860_v30 }
 0x3cb   : > { %v1872_v31 = vpop.eup %1871  ;;  %v1835_v32 = vpop.permute.xlu0 %1834 }
 0x3cc   : > { %v863_v33 = vsel %vm847_vm11, %v1872_v31, 0.0  ;;  %v1836_v34 = vunpack.i.l.bf16 %v1835_v32  ;;  %v1837_v35 = vunpack.i.h.bf16 %v1835_v32 }
 0x3cd   : > { %864 = vadd.xlane.f32.xlu1 %v863_v33 }
 0x3ce   : > { %896 = vmatpush.msra.mxu3 %v1836_v34 }
 0x3d0   : > { %897 = vmatpush.msra.mxu3 %v1837_v35 }
 0x3d2   : > { %1700 = vmatpush.xpose.msk.msrb.mxu3 %vm807_vm10, %v912_v21 }
 0x3d3   : > { %v910_v36 = vpop.permute.xlu0 %909 }
 0x3d6   : > { %1701 = vmatpush.xpose.msk.msrb.mxu3 %vm807_vm10, %v910_v36 }
 0x3d8   : > { %v1010_v37 = vpop.permute.xlu1 %1009 }
 0x3db   : > { %v906_v38 = vpop.permute.xlu0 %905 }
 0x3dd   : > { %1011 = vrot.lane.b32.xlu2 %v2383_v1, %s2116_s26 }
 0x3e0   : > { %v1006_v39 = vpop.permute.xlu1 %1005 }
 0x3e3   : > { %v1112_v41 = vpop.permute.xlu0 %1111 }
 0x3e5   : > { %1107 = vrot.lane.b32.xlu2 %v2383_v1, %s2119_s1 }
 0x3e6   : > { %1007 = vrot.lane.b32.xlu1 %v2383_v1, %s2117_s20  ;;  %s2043_s20 = sshra.s32 %s1571_s8, 4  ;;  %s2044_s20 = int_to_ptr.hbm [resolvable:$true] %s2043_s20 }
 0x3e7   : > { %s2045_s21 = scalar_lea.hbm %s2044_s20, 1  ;;  %p2050_p3 = scmp.lt.s32.totalorder %s2044_s20, %s2632_s2 }
 0x3e8   : > { %p2046_p0 = scmp.ne.s32.totalorder %s2044_s20, %s2045_s21 }
 0x3ea   : > { %p2047_p1 = pnand %p2046_p0, %p2259_p5 }
 0x3eb   : > { %v1110_v46 = vpop.permute.xlu0 %1109 }
 0x3ec   : > { %p2048_p2 = pneg %p2047_p1 }
 0x3f3   : > { %v1106_v50 = vpop.permute.xlu0 %1105 }
 0x438   : > { %v862_v40 = vpop.xlane.xlu2 %861 }
 0x439   : > { %1873 = vrcp.f32 %v862_v40 }
 0x43f   : > { %v1874_v42 = vpop.eup %1873 }
 0x440   : > { %v1012_v43 = vpop.permute.xlu2 %1011  ;;  %v865_v44 = vpop.xlane.xlu1 %864  ;;  %v868_v45 = vmul.f32 %v1874_v42, %v1870_v28 }
 0x441   : > { %1875 = vrcp.f32 %v865_v44  ;;  %1706 = vmatpush.xpose.msk.msrb.mxu2 %vm807_vm10, %v1012_v43 }
 0x442   : > { %1698 = vmatmul.msk.f32.vlgmr.msra.gmra.mxu3 %vm847_vm11, %v868_v45 }
 0x443   : > { %1712 = vmatpush.xpose.msk.msra.mxu3 %vm807_vm10, %v1112_v41 }
 0x445   : > { %1707 = vmatpush.xpose.msk.msrb.mxu2 %vm807_vm10, %v1010_v37 }
 0x447   : > { %v1876_v47 = vpop.eup %1875  ;;  %1713 = vmatpush.xpose.msk.msra.mxu3 %vm807_vm10, %v1110_v46 }
 0x448   : > { %1708 = vmatmul.msk.f32.vlgmr.msrb.gmra.mxu2 %vm807_vm10, %v1006_v39  ;;  %v869_v48 = vmul.f32 %v1876_v47, %v1872_v31  ;;  %v1108_v51 = vpop.permute.xlu2 %1107 }
 0x44a   : > { %1699 = vmatmul.msk.f32.gmra.mxu3 %vm847_vm11, %v869_v48 }
 0x452   : > { %1702 = vmatmul.msk.f32.vlgmr.msrb.gmra.mxu3 %vm807_vm10, %v906_v38 }
 0x458   : > { %v1008_v49 = vpop.permute.xlu1 %1007 }
 0x459   : > { %1709 = vmatmul.msk.f32.gmra.mxu2 %vm807_vm10, %v1008_v49 }
 0x45a   : > { %1703 = vmatmul.msk.f32.gmra.mxu3 %vm807_vm10, %v908_v22 }
 0x462   : > { %1714 = vmatmul.msk.f32.vlgmr.msra.gmra.mxu3 %vm807_vm10, %v1106_v50 }
 0x46a   : > { %1715 = vmatmul.msk.f32.gmra.mxu3 %vm807_vm10, %v1108_v51 }
 0x4c5   : > { %v2438_v52 = vpop.f32.mrf.mxu3 }
 0x4cb   : > { %v1038_v53 = vpop.f32.mrf.mxu2 }
 0x4cc   : > { %v1044_v54 = vmul.f32 0.35355338, %v1038_v53 }
 0x4cd   : > { %v2440_v55 = vpop.f32.mrf.mxu3 }
 0x4ce   : > { %v1046_v56 = vsub.f32 %v1044_v54, %v2402_v8 }
 0x4d0   : > { %v1048_v57 = vsel %vm847_vm11, %v1046_v56, -inf }
 0x4d1   : > { %1049 = vmax.xlane.f32.xlu2 %v1048_v57 }
 0x4d5   : > { %v938_v58 = vpop.f32.mrf.mxu3 }
 0x4d6   : > { %v944_v59 = vmul.f32 0.35355338, %v938_v58 }
 0x4d8   : > { %v946_v60 = vsub.f32 %v944_v59, %v2402_v8 }
 0x4da   : > { %v948_v61 = vsel %vm847_vm11, %v946_v60, -inf }
 0x4db   : > { %949 = vmax.xlane.f32.xlu0 %v948_v61 }
 0x4dc   : > { %v1041_v62 = vpop.f32.mrf.mxu2 }
 0x4dd   : > { %v1045_v63 = vmul.f32 0.35355338, %v1041_v62  ;;  %v941_v0 = vpop.f32.mrf.mxu3 }
 0x4de   : > { %v945_v1 = vmul.f32 0.35355338, %v941_v0 }
 0x4df   : > { %v1047_v2 = vsub.f32 %v1045_v63, %v2402_v8 }
 0x4e0   : > { %v947_v3 = vsub.f32 %v945_v1, %v2402_v8 }
 0x4e1   : > { %v1051_v4 = vsel %vm847_vm11, %v1047_v2, -inf }
 0x4e2   : > { %1052 = vmax.xlane.f32.xlu2 %v1051_v4  ;;  %v951_v5 = vsel %vm847_vm11, %v947_v3, -inf }
 0x4e3   : > { %952 = vmax.xlane.f32.xlu1 %v951_v5 }
 0x4e5   : > { %v1138_v7 = vpop.f32.mrf.mxu3 }
 0x4e6   : > { %v1144_v9 = vmul.f32 0.35355338, %v1138_v7 }
 0x4e8   : > { %v1146_v11 = vsub.f32 %v1144_v9, %v2402_v8 }
 0x4ea   : > { %v1148_v13 = vsel %vm847_vm11, %v1146_v11, -inf }
 0x4eb   : > { %1149 = vmax.xlane.f32.xlu0 %v1148_v13 }
 0x4ed   : > { %v1141_v14 = vpop.f32.mrf.mxu3 }
 0x4ee   : > { %v1145_v15 = vmul.f32 0.35355338, %v1141_v14 }
 0x4f0   : > { %v1147_v16 = vsub.f32 %v1145_v15, %v2402_v8 }
 0x4f2   : > { %v1151_v17 = vsel %vm847_vm11, %v1147_v16, -inf }
 0x4f3   : > { %1152 = vmax.xlane.f32.xlu1 %v1151_v17 }
 0x4fa   : > { %1839 = vrot.lane.b32.xlu2 %v2409_v19, %s2120_s23 }
 0x502   : > { %1849 = vrot.lane.b32.xlu2 %v2409_v19, %s2121_s12  ;;  %s2049_s12 = scalar_lea.hbm %s2632_s2, 2 }
 0x503   : > { %p2051_p4 = scmp.lt.s32.totalorder %s2049_s12, %s2045_s21 }
 0x505   : > { %p2052_p7 = por %p2051_p4, %p2050_p3 }
 0x507   : > { %p2053_p8 = pnand %p2052_p7, %p2048_p2 }
 0x544   : > { %v1050_v18 = vpop.xlane.xlu2 %1049 }
 0x545   : > { %v1054_v21 = vsub.f32 %v1046_v56, %v1050_v18 }
 0x547   : > { %v1056_v22 = vmul.f32 1.442695, %v1054_v21 }
 0x549   : > { %1877 = vpow2.f32 %v1056_v22 }
 0x54e   : > { %v950_v23 = vpop.xlane.xlu0 %949 }
 0x54f   : > { %v2456_v24 = vpop.eup %1877  ;;  %v954_v25 = vsub.f32 %v946_v60, %v950_v23 }
 0x550   : > { %v1060_v8 = vsel %vm847_vm11, %v2456_v24, 0.0 }
 0x551   : > { %v956_v26 = vmul.f32 1.442695, %v954_v25  ;;  %1061 = vadd.xlane.f32.xlu0 %v1060_v8  ;;  %v1239_v25 = vld [vmem:[#allocation2 + $0x18] sm:$0xff]  ;;  %v1238_v8 = vld [vmem:[#allocation2 + $0x10] sm:$0xff] }
 0x552   : > { %1262 = vmatpush.msra.mxu2 %v1239_v25 }
 0x553   : > { %1879 = vpow2.f32 %v956_v26  ;;  %v1237_v26 = vld [vmem:[#allocation2 + $0x8] sm:$0xff] }
 0x554   : > { %1263 = vmatpush.msra.mxu2 %v1238_v8 }
 0x555   : > { %v1053_v27 = vpop.xlane.xlu2 %1052 }
 0x556   : > { %v1055_v28 = vsub.f32 %v1047_v2, %v1053_v27  ;;  %v953_v29 = vpop.xlane.xlu1 %952  ;;  %1264 = vmatpush.msra.mxu2 %v1237_v26  ;;  %v1236_v27 = vld [vmem:[#allocation2] sm:$0xff] }
 0x557   : > { %v955_v31 = vsub.f32 %v947_v3, %v953_v29 }
 0x558   : > { %v1058_v30 = vmul.f32 1.442695, %v1055_v28  ;;  %1265 = vmatpush.msra.mxu2 %v1236_v27 }
 0x559   : > { %v1880_v32 = vpop.eup %1879  ;;  %v958_v34 = vmul.f32 1.442695, %v955_v31 }
 0x55a   : > { %1881 = vpow2.f32 %v1058_v30  ;;  %v960_v33 = vsel %vm847_vm11, %v1880_v32, 0.0 }
 0x55b   : > { %961 = vadd.xlane.f32.xlu0 %v960_v33  ;;  %1883 = vpow2.f32 %v958_v34 }
 0x55d   : > { %v1840_v35 = vpop.permute.xlu2 %1839 }
 0x55e   : > { %v1150_v36 = vpop.xlane.xlu0 %1149  ;;  %v1841_v37 = vunpack.i.l.bf16 %v1840_v35  ;;  %v1842_v40 = vunpack.i.h.bf16 %v1840_v35 }
 0x55f   : > { %v1154_v39 = vsub.f32 %v1146_v11, %v1150_v36 }
 0x560   : > { %v1882_v38 = vpop.eup %1881  ;;  %996 = vmatpush.msrb.mxu1 %v1841_v37 }
 0x561   : > { %v1063_v41 = vsel %vm847_vm11, %v1882_v38, 0.0  ;;  %v1156_v42 = vmul.f32 1.442695, %v1154_v39  ;;  %v1884_v44 = vpop.eup %1883 }
 0x562   : > { %1064 = vadd.xlane.f32.xlu1 %v1063_v41  ;;  %997 = vmatpush.msrb.mxu1 %v1842_v40  ;;  %v963_v49 = vsel %vm847_vm11, %v1884_v44, 0.0 }
 0x563   : > { %1885 = vpow2.f32 %v1156_v42 }
 0x565   : > { %v1850_v43 = vpop.permute.xlu2 %1849 }
 0x566   : > { %v1851_v45 = vunpack.i.l.bf16 %v1850_v43  ;;  %v1153_v46 = vpop.xlane.xlu1 %1152  ;;  %v1852_v47 = vunpack.i.h.bf16 %v1850_v43 }
 0x567   : > { %v1155_v48 = vsub.f32 %v1147_v16, %v1153_v46 }
 0x568   : > { %1196 = vmatpush.msra.mxu1 %v1851_v45 }
 0x569   : > { %v1158_v50 = vmul.f32 1.442695, %v1155_v48  ;;  %v1886_v51 = vpop.eup %1885 }
 0x56a   : > { %1197 = vmatpush.msra.mxu1 %v1852_v47  ;;  %964 = vadd.xlane.f32.xlu1 %v963_v49  ;;  %v1160_v53 = vsel %vm847_vm11, %v1886_v51, 0.0 }
 0x56b   : > { %1887 = vpow2.f32 %v1158_v50 }
 0x56f   : > { %1844 = vrot.lane.b32.xlu0 %v2409_v19, %s2122_s17  ;;  %s2630_s17 = sld [smem:[#allocation27_spill]] }
 0x571   : > { %v1888_v54 = vpop.eup %1887 }
 0x572   : > { %1161 = vadd.xlane.f32.xlu1 %v1160_v53  ;;  %v1163_v56 = vsel %vm847_vm11, %v1888_v54, 0.0 }
 0x57a   : > { %1164 = vadd.xlane.f32.xlu1 %v1163_v56 }
 0x5c4   : > { %v1062_v57 = vpop.xlane.xlu0 %1061 }
 0x5ce   : > { %v962_v58 = vpop.xlane.xlu0 %961 }
 0x5cf   : > { %1889 = vrcp.f32 %v962_v58  ;;  %v1333_v58 = vld [vmem:[#allocation5 + $0x10] sm:$0xff] }
 0x5d0   : > { %1891 = vrcp.f32 %v1062_v57  ;;  %v1334_v57 = vld [vmem:[#allocation5 + $0x18] sm:$0xff] }
 0x5d5   : > { %v1890_v59 = vpop.eup %1889  ;;  %v1065_v60 = vpop.xlane.xlu1 %1064 }
 0x5d6   : > { %v968_v61 = vmul.f32 %v1890_v59, %v1880_v32  ;;  %v1892_v63 = vpop.eup %1891  ;;  %v1332_v59 = vld [vmem:[#allocation5 + $0x8] sm:$0xff] }
 0x5d7   : > { %v1068_v3 = vmul.f32 %v1892_v63, %v2456_v24 }
 0x5d8   : > { %1704 = vmatmul.msk.f32.vlgmr.msrb.gmra.mxu1 %vm847_vm11, %v968_v61 }
 0x5dd   : > { %v965_v62 = vpop.xlane.xlu1 %964 }
 0x5de   : > { %1893 = vrcp.f32 %v965_v62 }
 0x5df   : > { %1895 = vrcp.f32 %v1065_v60  ;;  %v1331_v60 = vld [vmem:[#allocation5] sm:$0xff] }
 0x5e1   : > { %v1845_v19 = vpop.permute.xlu0 %1844 }
 0x5e2   : > { %v1846_v0 = vunpack.i.l.bf16 %v1845_v19  ;;  %v1847_v2 = vunpack.i.h.bf16 %v1845_v19 }
 0x5e4   : > { %v1894_v1 = vpop.eup %1893  ;;  %1096 = vmatpush.msra.mxu0 %v1846_v0 }
 0x5e5   : > { %v1162_v4 = vpop.xlane.xlu1 %1161  ;;  %v969_v5 = vmul.f32 %v1894_v1, %v1884_v44  ;;  %v1896_v7 = vpop.eup %1895 }
 0x5e6   : > { %1897 = vrcp.f32 %v1162_v4  ;;  %1097 = vmatpush.msra.mxu0 %v1847_v2  ;;  %v1069_v14 = vmul.f32 %v1896_v7, %v1882_v38 }
 0x5e7   : > { %1705 = vmatmul.msk.f32.gmra.mxu1 %vm847_vm11, %v969_v5  ;;  %1710 = vmatmul.msk.f32.vlgmr.msra.gmra.mxu0 %vm847_vm11, %v1068_v3 }
 0x5e8   : > { %1357 = vmatpush.msrb.mxu0 %v1334_v57 }
 0x5ea   : > { %1358 = vmatpush.msrb.mxu0 %v1333_v58 }
 0x5ec   : > { %v1898_v9 = vpop.eup %1897  ;;  %1359 = vmatpush.msrb.mxu0 %v1332_v59 }
 0x5ed   : > { %v1168_v11 = vmul.f32 %v1898_v9, %v1886_v51  ;;  %v1165_v13 = vpop.xlane.xlu1 %1164 }
 0x5ee   : > { %1899 = vrcp.f32 %v1165_v13  ;;  %1360 = vmatpush.msrb.mxu0 %v1331_v60  ;;  %v1456_v60 = vld [vmem:[#allocation7] sm:$0xff] }
 0x5ef   : > { %1711 = vmatmul.msk.f32.gmra.mxu0 %vm847_vm11, %v1069_v14  ;;  %1716 = vmatmul.msk.f32.vlgmr.msra.gmra.mxu1 %vm847_vm11, %v1168_v11  ;;  %v1858_v14 = vld [vmem:[%s2587_s10] ss:$0 sm:$0xff] }
 0x5f4   : > { %v1900_v15 = vpop.eup %1899 }
 0x5f5   : > { %v1169_v16 = vmul.f32 %v1900_v15, %v1888_v54 }
 0x5f7   : > { %1717 = vmatmul.msk.f32.gmra.mxu1 %vm847_vm11, %v1169_v16 }
 0x655   : > { %v999_v17 = vpop.f32.mrf.mxu1 }
 0x656   : > { %1207 = vrot.lane.b32.xlu0 %v999_v17, %s2123_s18  ;;  %v1859_v17 = vld [vmem:[%s2588_s11] ss:$0 sm:$0xff] }
 0x664   : > { %v1002_v18 = vpop.f32.mrf.mxu1  ;;  %v1099_v21 = vpop.f32.mrf.mxu0 }
 0x665   : > { %1215 = vrot.lane.b32.xlu2 %v1099_v21, %s2124_s27  ;;  %1209 = vrot.lane.b32.xlu0 %v1002_v18, %s2123_s18 }
 0x66c   : > { %v1102_v22 = vpop.f32.mrf.mxu0  ;;  %v1199_v23 = vpop.f32.mrf.mxu1 }
 0x66d   : > { %1217 = vrot.lane.b32.xlu2 %v1102_v22, %s2124_s27  ;;  %1223 = vrot.lane.b32.xlu1 %v1199_v23, %s2125_s29  ;;  %s644_s27 = sand.u32 1, %s2095_s28  }
 0x66e   : > { %s645_s19 = scalar_lea.vmem [#allocation10], %s644_s27  ;;  %s1558_s26 = scalar_lea.sflag [#allocation4], %s644_s27 }
 0x66f   : > { %s1568_s25 = sshll.u32 %s645_s19, 4  ;;  %s1569_s25 = int_to_ptr.vmem [resolvable:$true] %s1568_s25 }
 0x674   : > { %v1202_v24 = vpop.f32.mrf.mxu1 }
 0x675   : > { %1225 = vrot.lane.b32.xlu0 %v1202_v24, %s2125_s29 }
 0x6bf   : > { %v1216_v29 = vpop.permute.xlu2 %1215 }
 0x6c7   : > { %v1218_v36 = vpop.permute.xlu2 %1217 }
 0x6c8   : > { %v1208_v28 = vpop.permute.xlu0 %1207 }
 0x6c9   : > { %v1229_v30 = vsel %vm807_vm10, %v2438_v52, %v1208_v28  ;;  %v1857_v52 = vld [vmem:[%s2586_s9] ss:$0 sm:$0xff] }
 0x6ca   : > { %v1231_v32 = vsel %vm847_vm11, %v1229_v30, %v1216_v29  ;;  %v1860_v28 = vld [vmem:[%s2590_s13] ss:$0 sm:$0xff] }
 0x6d7   : > { %v1210_v31 = vpop.permute.xlu0 %1209 }
 0x6d8   : > { %v1230_v35 = vsel %vm807_vm10, %v2440_v55, %v1210_v31 }
 0x6d9   : > { %v1232_v38 = vsel %vm847_vm11, %v1230_v35, %v1218_v36 }
 0x6df   : > { %v1224_v33 = vpop.permute.xlu1 %1223 }
 0x6e0   : > { %v1234_v34 = vsel %vm1233_vm12, %v1231_v32, %v1224_v33 }
 0x6e1   : > { %1718 = vmatmul.msk.f32.vlgmr.msra.gmra.mxu2 %vm702_vm2, %v1234_v34 }
 0x6e7   : > { %v1226_v37 = vpop.permute.xlu0 %1225 }
 0x6e8   : > { %v1235_v39 = vsel %vm1233_vm12, %v1232_v38, %v1226_v37 }
 0x6e9   : > { %1719 = vmatmul.msk.f32.gmra.mxu2 %vm702_vm2, %v1235_v39 }
 0x764   : > { %v1267_v40 = vpop.f32.mrf.mxu2 }
 0x765   : > { %v1268_v41 = vadd.f32 %v1857_v52, %v1267_v40 }
 0x767   : > { %v2485_v42 = vadd.f32 %v1268_v41, %v2346_v12 }
 0x769   : > { %v1277_v43 = vsel %vm702_vm2, %v2485_v42, 0.0 }
 0x76a   : > { %1278 = vadd.xlane.f32.xlu2 %v1277_v43 }
 0x76c   : > { %v1270_v55 = vpop.f32.mrf.mxu2 }
 0x76d   : > { %v1271_v44 = vadd.f32 %v1857_v52, %v1270_v55 }
 0x76f   : > { %v2490_v45 = vadd.f32 %v1271_v44, %v2342_v10 }
 0x771   : > { %v1280_v46 = vsel %vm702_vm2, %v2490_v45, 0.0 }
 0x772   : > { %1281 = vadd.xlane.f32.xlu0 %v1280_v46 }
 0x7dd   : > { %v1279_v47 = vpop.xlane.xlu2 %1278 }
 0x7de   : > { %v1283_v48 = vmul.f32 %v1279_v47, %v2350_v20  ;;  %v1459_v47 = vld [vmem:[#allocation7 + $0x18] sm:$0xff] }
 0x7df   : > { %1482 = vmatpush.msrb.mxu3 %v1459_v47 }
 0x7e0   : > { %v1285_v49 = vsub.f32 %v2485_v42, %v1283_v48 }
 0x7e2   : > { %v1287_v12 = vmul.f32 %v1285_v49, %v1285_v49 }
 0x7e4   : > { %v1289_v50 = vsel %vm702_vm2, %v1287_v12, 0.0 }
 0x7e5   : > { %v1282_v51 = vpop.xlane.xlu0 %1281  ;;  %1290 = vadd.xlane.f32.xlu1 %v1289_v50  ;;  %v1458_v50 = vld [vmem:[#allocation7 + $0x10] sm:$0xff] }
 0x7e6   : > { %v1284_v53 = vmul.f32 %v1282_v51, %v2350_v20  ;;  %1483 = vmatpush.msrb.mxu3 %v1458_v50 }
 0x7e8   : > { %v1286_v54 = vsub.f32 %v2490_v45, %v1284_v53 }
 0x7ea   : > { %v1288_v10 = vmul.f32 %v1286_v54, %v1286_v54 }
 0x7ec   : > { %v1292_v56 = vsel %vm702_vm2, %v1288_v10, 0.0 }
 0x7ed   : > { %1293 = vadd.xlane.f32.xlu2 %v1292_v56  ;;  %v1457_v56 = vld [vmem:[#allocation7 + $0x8] sm:$0xff] }
 0x7ee   : > { %1484 = vmatpush.msrb.mxu3 %v1457_v56 }
 0x7f0   : > { %1485 = vmatpush.msrb.mxu3 %v1456_v60 }
 0x858   : > { %v1291_v61 = vpop.xlane.xlu1 %1290 }
 0x859   : > { %v1295_v62 = vmul.f32 %v1291_v61, %v2350_v20 }
 0x85b   : > { %v1297_v19 = vadd.f32 1e-05, %v1295_v62 }
 0x85d   : > { %1901 = vrsqrt.f32 %v1297_v19  ;;  %vm1305_vm14 = vweird.f32 %v1297_v19 }
 0x860   : > { %v1294_v63 = vpop.xlane.xlu2 %1293 }
 0x861   : > { %v1296_v0 = vmul.f32 %v1294_v63, %v2350_v20 }
 0x863   : > { %v1902_v1 = vpop.eup %1901  ;;  %v1298_v2 = vadd.f32 1e-05, %v1296_v0 }
 0x864   : > { %v1300_v3 = vmul.f32 %v1902_v1, %v1297_v19  ;;  %vm1306_vm13 = vweird.f32 %v1902_v1 }
 0x865   : > { %1903 = vrsqrt.f32 %v1298_v2  ;;  %vm1307_vm15 = vmor %vm1305_vm14, %vm1306_vm13  ;;  %vm1315_vm1 = vweird.f32 %v1298_v2 }
 0x866   : > { %v1301_v4 = vmul.f32 %v1902_v1, %v1300_v3 }
 0x868   : > { %v1302_v5 = vmul.f32 0.5, %v1301_v4 }
 0x86a   : > { %v1303_v7 = vsub.f32 1.5, %v1302_v5 }
 0x86b   : > { %v1904_v9 = vpop.eup %1903 }
 0x86c   : > { %v1304_v11 = vmul.f32 %v1902_v1, %v1303_v7  ;;  %v1310_v13 = vmul.f32 %v1904_v9, %v1298_v2  ;;  %vm1316_vm0 = vweird.f32 %v1904_v9 }
 0x86d   : > { %vm1317_vm3 = vmor %vm1315_vm1, %vm1316_vm0 }
 0x86e   : > { %v1308_v15 = vsel %vm1307_vm15, %v1902_v1, %v1304_v11  ;;  %v1311_v16 = vmul.f32 %v1904_v9, %v1310_v13 }
 0x86f   : > { %v1319_v20 = vmul.f32 %v1308_v15, %v1285_v49 }
 0x870   : > { %v1312_v18 = vmul.f32 0.5, %v1311_v16 }
 0x871   : > { %v1324_v21 = vmul.f32 %v1858_v14, %v1319_v20 }
 0x872   : > { %v1313_v22 = vsub.f32 1.5, %v1312_v18 }
 0x873   : > { %v1329_v23 = vadd.f32 %v1859_v17, %v1324_v21 }
 0x874   : > { %v1314_v24 = vmul.f32 %v1904_v9, %v1313_v22 }
 0x875   : > { %1720 = vmatmul.msk.f32.vlgmr.msrb.gmra.mxu0 %vm702_vm2, %v1329_v23 }
 0x876   : > { %v1318_v25 = vsel %vm1317_vm3, %v1904_v9, %v1314_v24  ;;  %v1498_v9 = vld [vmem:[#allocation8 + $0x18] sm:$0xff] }
 0x877   : > { %v1320_v8 = vmul.f32 %v1318_v25, %v1286_v54  ;;  %1521 = vmatpush.msrb.mxu1 %v1498_v9 }
 0x879   : > { %v1325_v26 = vmul.f32 %v1858_v14, %v1320_v8 }
 0x87b   : > { %v1330_v27 = vadd.f32 %v1859_v17, %v1325_v26 }
 0x87d   : > { %1721 = vmatmul.msk.f32.gmra.mxu0 %vm702_vm2, %v1330_v27 }
 0x8f2   : > { %v1362_v29 = vpop.f32.mrf.mxu0 }
 0x8f3   : > { %v2513_v30 = vadd.f32 %v1860_v28, %v1362_v29 }
 0x8f5   : > { %v2516_v31 = vmul.f32 0.70710677, %v2513_v30  ;;  %v1368_v47 = vmul.f32 0.5, %v2513_v30  ;;  %v1497_v30 = vld [vmem:[#allocation8 + $0x10] sm:$0xff] }
 0x8f6   : > { %1522 = vmatpush.msrb.mxu1 %v1497_v30 }
 0x8f7   : > { %v1372_v32 = vmul.f32 %v2516_v31, %v2516_v31 }
 0x8f9   : > { %v1373_v33 = vmin.f32 %v1372_v32, 16.0 }
 0x8fa   : > { %v1365_v34 = vpop.f32.mrf.mxu0 }
 0x8fb   : > { %v1374_v35 = vmul.f32 2.1237322e-06, %v1373_v33  ;;  %v1385_v36 = vmul.f32 3.8918573e-05, %v1373_v33  ;;  %v2520_v37 = vadd.f32 %v1860_v28, %v1365_v34 }
 0x8fd   : > { %v1375_v38 = vadd.f32 0.00028619796, %v1374_v35  ;;  %v1386_v39 = vadd.f32 0.001143296, %v1385_v36  ;;  %v2523_v52 = vmul.f32 0.70710677, %v2520_v37 }
 0x8ff   : > { %v1376_v40 = vmul.f32 %v1375_v38, %v1373_v33  ;;  %v1387_v41 = vmul.f32 %v1386_v39, %v1373_v33  ;;  %v1412_v43 = vmul.f32 %v2523_v52, %v2523_v52 }
 0x901   : > { %v1388_v55 = vadd.f32 0.014752088, %v1387_v41  ;;  %v1377_v44 = vadd.f32 0.0036580483, %v1376_v40  ;;  %v1413_v46 = vmin.f32 %v1412_v43, 16.0 }
 0x903   : > { %v1389_v48 = vmul.f32 %v1388_v55, %v1373_v33  ;;  %v1414_v49 = vmul.f32 2.1237322e-06, %v1413_v46  ;;  %v1425_v12 = vmul.f32 3.8918573e-05, %v1413_v46  ;;  %v1378_v53 = vmul.f32 %v1377_v44, %v1373_v33 }
 0x905   : > { %v1390_v51 = vadd.f32 0.112945676, %v1389_v48  ;;  %v1415_v54 = vadd.f32 0.00028619796, %v1414_v49  ;;  %v1426_v10 = vadd.f32 0.001143296, %v1425_v12 }
 0x906   : > { %v1379_v62 = vadd.f32 0.05243302, %v1378_v53 }
 0x907   : > { %v1391_v57 = vmul.f32 %v1390_v51, %v1373_v33  ;;  %v1416_v58 = vmul.f32 %v1415_v54, %v1413_v46  ;;  %v1427_v59 = vmul.f32 %v1426_v10, %v1413_v46  ;;  %v1369_v10 = vmul.f32 0.5, %v2520_v37 }
 0x908   : > { %v1380_v3 = vmul.f32 %v1379_v62, %v1373_v33 }
 0x909   : > { %v1392_v61 = vadd.f32 0.4994258, %v1391_v57  ;;  %v1428_v19 = vadd.f32 0.014752088, %v1427_v59  ;;  %v1417_v0 = vadd.f32 0.0036580483, %v1416_v58 }
 0x90a   : > { %v1381_v11 = vadd.f32 0.18741608, %v1380_v3  ;;  %v1496_v58 = vld [vmem:[#allocation8 + $0x8] sm:$0xff]  ;;  %v1495_v59 = vld [vmem:[#allocation8] sm:$0xff] }
 0x90b   : > { %v1393_v63 = vmul.f32 %v1392_v61, %v1373_v33  ;;  %v1429_v1 = vmul.f32 %v1428_v19, %v1413_v46  ;;  %v1418_v5 = vmul.f32 %v1417_v0, %v1413_v46  ;;  %1523 = vmatpush.msrb.mxu1 %v1496_v58 }
 0x90c   : > { %v1382_v20 = vmul.f32 %v1381_v11, %v1373_v33 }
 0x90d   : > { %v1394_v2 = vadd.f32 1.0, %v1393_v63  ;;  %v1430_v4 = vadd.f32 0.112945676, %v1429_v1  ;;  %v1419_v14 = vadd.f32 0.05243302, %v1418_v5  ;;  %1524 = vmatpush.msrb.mxu1 %v1495_v59 }
 0x90e   : > { %v1383_v24 = vadd.f32 1.1283791, %v1382_v20  ;;  %v1862_v1 = vld [vmem:[%s2630_s17] ss:$0 sm:$0xff] }
 0x90f   : > { %1905 = vrcp.f32 %v1394_v2  ;;  %v1431_v7 = vmul.f32 %v1430_v4, %v1413_v46  ;;  %v1420_v21 = vmul.f32 %v1419_v14, %v1413_v46  ;;  %v1406_v23 = vand.u32 2147483648, %v1394_v2 }
 0x910   : > { %v1404_v8 = vand.u32 2147483647, %v1394_v2  ;;  %vm1400_vm5 = vweird.f32 %v1394_v2  ;;  %v1384_v32 = vmul.f32 %v1383_v24, %v2516_v31  ;;  %v1532_v4 = vsub.f32 1.0, %v2399_v6 }
 0x911   : > { %v1432_v13 = vadd.f32 0.4994258, %v1431_v7  ;;  %v1421_v26 = vadd.f32 0.18741608, %v1420_v21  ;;  %v1407_v28 = vor.u32 1.1754944e-38, %v1406_v23 }
 0x912   : > { %vm1405_vm7 = vcmp.eq.f32.partialorder %v1404_v8, 8.507059e+37 }
 0x913   : > { %v1433_v15 = vmul.f32 %v1432_v13, %v1413_v46  ;;  %v1422_v35 = vmul.f32 %v1421_v26, %v1413_v46 }
 0x915   : > { %v1906_v16 = vpop.eup %1905  ;;  %v1434_v18 = vadd.f32 1.0, %v1433_v15  ;;  %v1423_v43 = vadd.f32 1.1283791, %v1422_v35 }
 0x916   : > { %v1396_v17 = vmul.f32 %v1906_v16, %v1394_v2  ;;  %vm1401_vm4 = vweird.f32 %v1906_v16 }
 0x917   : > { %1907 = vrcp.f32 %v1434_v18  ;;  %vm1402_vm6 = vmor %vm1400_vm5, %vm1401_vm4  ;;  %v1446_v41 = vand.u32 2147483648, %v1434_v18  ;;  %v1444_v44 = vand.u32 2147483647, %v1434_v18  ;;  %vm1440_vm9 = vweird.f32 %v1434_v18 }
 0x918   : > { %v1397_v22 = vsub.f32 1.0, %v1396_v17  ;;  %v1424_v50 = vmul.f32 %v1423_v43, %v2523_v52  ;;  %v1861_v52 = vld [vmem:[%s2592_s15] ss:$0 sm:$0xff] }
 0x919   : > { %v1447_v31 = vor.u32 1.1754944e-38, %v1446_v41  ;;  %vm1445_vm12 = vcmp.eq.f32.partialorder %v1444_v44, 8.507059e+37 }
 0x91a   : > { %v1398_v25 = vmul.f32 %v1906_v16, %v1397_v22 }
 0x91c   : > { %v1399_v27 = vadd.f32 %v1906_v16, %v1398_v25 }
 0x91d   : > { %v1908_v29 = vpop.eup %1907 }
 0x91e   : > { %v1403_v34 = vsel %vm1402_vm6, %v1906_v16, %v1399_v27  ;;  %v1436_v36 = vmul.f32 %v1908_v29, %v1434_v18  ;;  %vm1441_vm8 = vweird.f32 %v1908_v29 }
 0x91f   : > { %v1408_v33 = vsel %vm1405_vm7, %v1407_v28, %v1403_v34  ;;  %vm1442_vm10 = vmor %vm1440_vm9, %vm1441_vm8 }
 0x920   : > { %v1409_v38 = vmul.f32 %v1408_v33, %v1384_v32  ;;  %v1437_v39 = vsub.f32 1.0, %v1436_v36 }
 0x922   : > { %v1722_v40 = vclamps-f32 %v1409_v38, 1.0  ;;  %v1438_v55 = vmul.f32 %v1908_v29, %v1437_v39 }
 0x924   : > { %v1452_v48 = vadd.f32 1.0, %v1722_v40  ;;  %v1439_v49 = vadd.f32 %v1908_v29, %v1438_v55 }
 0x926   : > { %v1454_v12 = vmul.f32 %v1452_v48, %v1368_v47  ;;  %v1443_v46 = vsel %vm1442_vm10, %v1908_v29, %v1439_v49 }
 0x927   : > { %v1448_v51 = vsel %vm1445_vm12, %v1447_v31, %v1443_v46 }
 0x928   : > { %1724 = vmatmul.msk.f32.vlgmr.msrb.gmra.mxu3 %vm702_vm2, %v1454_v12  ;;  %v1449_v53 = vmul.f32 %v1448_v51, %v1424_v50 }
 0x92a   : > { %v1723_v54 = vclamps-f32 %v1449_v53, 1.0 }
 0x92c   : > { %v1453_v56 = vadd.f32 1.0, %v1723_v54 }
 0x92e   : > { %v1455_v57 = vmul.f32 %v1453_v56, %v1369_v10 }
 0x930   : > { %1725 = vmatmul.msk.f32.gmra.mxu3 %vm702_vm2, %v1455_v57 }
 0x9ab   : > { %v1487_v60 = vpop.f32.mrf.mxu3 }
 0x9ac   : > { %v1488_v61 = vadd.f32 %v1861_v52, %v1487_v60 }
 0x9ae   : > { %v1493_v62 = vadd.f32 %v1488_v61, %v2485_v42 }
 0x9b0   : > { %1726 = vmatmul.msk.f32.vlgmr.msrb.gmra.mxu1 %vm702_vm2, %v1493_v62 }
 0x9b3   : > { %v1490_v37 = vpop.f32.mrf.mxu3 }
 0x9b4   : > { %v1491_v19 = vadd.f32 %v1861_v52, %v1490_v37 }
 0x9b6   : > { %v1494_v63 = vadd.f32 %v1491_v19, %v2490_v45 }
 0x9b8   : > { %1727 = vmatmul.msk.f32.gmra.mxu1 %vm702_vm2, %v1494_v63 }
 0xa2d   : > { %v1526_v0 = vpop.f32.mrf.mxu1 }
 0xa2e   : > { %v1527_v5 = vadd.f32 %v1862_v1, %v1526_v0 }
 0xa35   : > { %v1529_v2 = vpop.f32.mrf.mxu1 }
 0xa36   : > { %v1530_v3 = vadd.f32 %v1862_v1, %v1529_v2 }
 0xa38   : > { %1550 = vmatpush.msrb.mxu2 %v1530_v3 }
 0xa3a   : > { %1551 = vmatpush.msrb.mxu2 %v1527_v5 }
 0xa3b   : > { %1728 = vmatmul.msk.f32.vlgmr.msrb.gmra.mxu2 %vm847_vm11, %v1532_v4 }
 0xabe   : > { %v1553_v42 = vpop.f32.mrf.mxu2 }
 0xabf   : > { %1556 = vst [vmem:[%s645_s19] sm:$0x1] %v1553_v42 }
 0xac0   : > { %2056 = shalt.err (!%p2053_p8)
}
 0xac1   : > { %1752 = dma.vmem_to_hbm [thread:$0]  (%p2259_p5), %s1569_s25, 16, %s1571_s8, %s1558_s26  }
 0xac2 PF: > { %s2633_s27 = sld [smem:[#allocation17_spill]] }
 0xac3   : > { %s2634_s29 = sld [smem:[#allocation15_spill]] }
 0xac8   : > { %p1779_p9 = scmp.ge.s32.totalorder %s2633_s27, 2 }
 0xac9   : > { %s1582_s24 = sand.u32 1, %s2634_s29  }
 0xaca   : > { %p1768_p10 = pnand %p1779_p9, %p2263_p6  ;;  %s1583_s19 = scalar_lea.sflag [#allocation4], %s1582_s24 }
 0xacc   : > { %p1769_p11 = pneg %p1768_p10 }
 0xace   : > { %2086 = dma.done.wait (%p1769_p11), %s1583_s19, 16  }
 0xacf   : > { %2088 = vsyncadd (%p1769_p11), %s1583_s19, 4294967280  ;;  %s2636_s30 = sld [smem:[#allocation18_spill]]  ;;  %s2639_s27 = smov %s2095_s28 }
 0xad0   : > { %s2637_s20 = sld [smem:[#allocation16_spill]] }
 0xad1   : > { %s2638_s29 = sld [smem:[#allocation19_spill]] }
 0xad5   : > { %p31_p12 = scmp.ge.s32.totalorder %s2636_s30, 4  }
 0xad6   : > { %s2640_s28 = smov %s2637_s20 }
 0xad7   :  { %33 = sbr.rel (!%p31_p12) target bundleno = 14 (0xe), region = 147 }
 0xadc   :  { %1588 = vsyncpa [#allocation3], 1 }
 0xadd   :  { %1590 = vsyncpa [#allocation3 + $0x1], 1 }
 0xade   :  { %1591 = vsyncpa [#allocation6], 1 }
 0xadf   :  { %1592 = vsyncpa [#allocation9], 1 }
 0xae0   :  { %1593 = vsyncpa [#allocation4], 1 }
 0xae1   :  { %1595 = vsyncpa [#allocation4 + $0x1], 1 }

</bundles_post_ra>
